<compile_context>
chip_gen: v5e
topology: v5e:2x2
jax: 0.10.0
libtpu: 0.0.40
codegen_flags: <defaults>
</compile_context>

<pallas_src>
import functools
import math

import jax
import jax.numpy as jnp
from jax.experimental import pallas as pl
from jax.experimental.pallas import tpu as pltpu


# ------------------------------ config ------------------------------
class Cfg:
    project_type = "linear"
    diagram_size = 16
    img_patch_size = 4
    encoder_embedding_size = 32
    project_dropout = 0.1
    pretrain_emb_path = ""


CHANNELS = 3
NUM_HEADS = 4
FFN_DIM = 64
VOCAB = 50          # src_lang.n_words
N_CLASS_TAG = 6     # len(src_lang.class_tag)
N_SECT_TAG = 5      # len(src_lang.sect_tag)


# ------------------------------ fused Pallas kernel ------------------------------
def _fused_encoder_kernel(
    # scalar prefetch (SMEM)
    len_ref,
    # per-batch activations (bc elements per grid step)
    patches_ref, text_ref,
    # weights (resident, broadcast across grid)
    patch_w_ref, patch_b_ref, pos_ref,
    attn_w_ref, attn_ut_ref, attn_bo_ref,
    w1_ref, b1_ref, w2_ref, b2_ref,
    ln1_g_ref, ln1_b_ref, ln2_g_ref, ln2_b_ref,
    # output
    o_ref,
    *, num_patches, num_heads, bc,
):
    P = num_patches
    H = num_heads
    _, S, D = o_ref.shape
    HD = H * D
    b0 = pl.program_id(0) * bc

    # ---- patch embedding + positional embedding + sequence assembly (merged over bc) ----
    if bc == 1:
        img = jnp.dot(patches_ref[0], patch_w_ref[...],
                      preferred_element_type=jnp.float32)                 # (P, D)
        img = img + patch_b_ref[...] + pos_ref[...]
        xm = jnp.concatenate([img, text_ref[0]], axis=0)                  # (S, D)
    else:
        pd = patches_ref.shape[-1]
        img = jnp.dot(patches_ref[...].reshape(bc * P, pd), patch_w_ref[...],
                      preferred_element_type=jnp.float32)                 # (bc*P, D)
        img = img.reshape(bc, P, D) + patch_b_ref[...] + pos_ref[...]
        xm = jnp.concatenate([img, text_ref[...]], axis=1).reshape(bc * S, D)

    # ---- attention operands: ONE lane-dense (bc*S, D) x (D, 2*H*D) MXU pass ----
    # cols [0, H*D)     : per-head score operand   x @ (scale * Wq_h Wk_h^T)
    # cols [H*D, 2*H*D) : per-head value/out fold  x @ (Wv_h Wo_h)
    xac = jnp.dot(xm, attn_w_ref[...], preferred_element_type=jnp.float32)  # (bc*S, 2*H*D)

    key_pos = jax.lax.broadcasted_iota(jnp.int32, (1, S), 1)

    attn_parts = []
    for b in range(bc):                                   # static, bc small
        xb = xm[b * S:(b + 1) * S, :]                     # (S, D)  sublane-aligned slice
        xab = xac[b * S:(b + 1) * S, :]                   # (S, 2*H*D)

        # key-padding mask (image patches always valid) + exact Q/K-bias key-correction,
        # hoisted out of the head loop.  head_bias[h] is added along the key axis.
        limit = P + len_ref[b0 + b]
        mask_bias = jnp.where(key_pos < limit, 0.0, -1e30)                # (1, S)
        corr = jax.lax.dot_general(attn_ut_ref[...], xb,
                                   (((1,), (1,)), ((), ())),
                                   preferred_element_type=jnp.float32)    # (H, S)
        head_bias = corr + mask_bias                                      # (H, S)

        acc = None
        for h in range(H):                                # static unroll
            s = jax.lax.dot_general(xab[:, h * D:(h + 1) * D], xb,
                                    (((1,), (1,)), ((), ())),
                                    preferred_element_type=jnp.float32)   # (S, S)
            s = s + head_bias[h:h + 1, :]
            s = s - jnp.max(s, axis=-1, keepdims=True)
            p = jnp.exp(s)
            p = p * pl.reciprocal(jnp.sum(p, axis=-1, keepdims=True), approx=True)
            pv = jnp.dot(p, xab[:, HD + h * D:HD + (h + 1) * D],
                         preferred_element_type=jnp.float32)              # (S, D)
            acc = pv if acc is None else acc + pv
        attn_parts.append(acc)

    attn = attn_parts[0] if bc == 1 else jnp.concatenate(attn_parts, axis=0)
    attn = attn + attn_bo_ref[...]                        # folded bo + bv @ wo

    # ---- residual + LayerNorm 1 ----
    h1 = xm + attn
    mu = jnp.mean(h1, axis=-1, keepdims=True)
    var = jnp.mean(jnp.square(h1 - mu), axis=-1, keepdims=True)
    h1 = (h1 - mu) * jax.lax.rsqrt(var + 1e-5) * ln1_g_ref[...] + ln1_b_ref[...]

    # ---- FFN (ReLU), merged over bc ----
    f = jnp.dot(h1, w1_ref[...], preferred_element_type=jnp.float32) + b1_ref[...]
    f = jnp.maximum(f, 0.0)
    f = jnp.dot(f, w2_ref[...], preferred_element_type=jnp.float32) + b2_ref[...]

    # ---- residual + LayerNorm 2 ----
    h2 = h1 + f
    mu2 = jnp.mean(h2, axis=-1, keepdims=True)
    var2 = jnp.mean(jnp.square(h2 - mu2), axis=-1, keepdims=True)
    h2 = (h2 - mu2) * jax.lax.rsqrt(var2 + 1e-5) * ln2_g_ref[...] + ln2_b_ref[...]

    if bc == 1:
        o_ref[0] = h2
    else:
        o_ref[...] = h2.reshape(bc, S, D)


def fused_transformer_pretrain(params, patches, text_emb, text_len):
    """patches: (B, P, patch_dim); text_emb: (B, L, D) (tok.sum(K)+sect+class); text_len: (B,)."""
    B, P, patch_dim = patches.shape
    _, L, D = text_emb.shape
    S = P + L
    H = NUM_HEADS
    assert D % H == 0
    hd = D // H
    # sublane-aligned concat/reshape inside the kernel relies on these
    assert P % 8 == 0 and L % 8 == 0, "num_patches and text length must be multiples of 8"
    scale = 1.0 / math.sqrt(hd)

    # ---- head-merged attention weights (exact refactor of per-head Q/K/V/out-proj) ----
    wq_r = params["wq"].reshape(D, H, hd)
    wk_r = params["wk"].reshape(D, H, hd)
    wv_r = params["wv"].reshape(D, H, hd)
    wo_r = params["wo"].reshape(H, hd, D)
    attn_a = (scale * jnp.einsum("dhe,fhe->dhf", wq_r, wk_r)).reshape(D, H * D)   # scale folded
    attn_c = jnp.einsum("dhe,hef->dhf", wv_r, wo_r).reshape(D, H * D)
    attn_w = jnp.concatenate([attn_a, attn_c], axis=1)                            # (D, 2*H*D)
    # exact key-side correction for Q/K biases (softmax row-constant terms dropped)
    attn_ut = scale * jnp.einsum("dhe,he->hd", wk_r, params["bq"].reshape(H, hd))  # (H, D)
    # V-bias folds through softmax rows summing to 1
    attn_bo = (params["bo"] + params["bv"] @ params["wo"]).reshape(1, D)

    # grid: 2 steps so both v7x TensorCores get a batched chunk; v5e/v6e pay one extra step.
    grid_n = 2 if (B >= 2 and B % 2 == 0) else 1
    bc = B // grid_n

    kernel = functools.partial(_fused_encoder_kernel,
                               num_patches=P, num_heads=H, bc=bc)

    pb = lambda g, lens: (g, 0, 0)   # per-batch-chunk blocks
    w2 = lambda g, lens: (0, 0)      # resident weights

    return pl.pallas_call(
        kernel,
        out_shape=jax.ShapeDtypeStruct((B, S, D), jnp.float32),
        grid_spec=pltpu.PrefetchScalarGridSpec(
            num_scalar_prefetch=1,
            grid=(grid_n,),
            in_specs=[
                pl.BlockSpec((bc, P, patch_dim), pb),
                pl.BlockSpec((bc, L, D), pb),
                pl.BlockSpec((patch_dim, D), w2),
                pl.BlockSpec((1, D), w2),
                pl.BlockSpec((P, D), w2),
                pl.BlockSpec((D, 2 * H * D), w2),
                pl.BlockSpec((H, D), w2),
                pl.BlockSpec((1, D), w2),
                pl.BlockSpec((D, FFN_DIM), w2),
                pl.BlockSpec((1, FFN_DIM), w2),
                pl.BlockSpec((FFN_DIM, D), w2),
                pl.BlockSpec((1, D), w2),
                pl.BlockSpec((1, D), w2),
                pl.BlockSpec((1, D), w2),
                pl.BlockSpec((1, D), w2),
                pl.BlockSpec((1, D), w2),
            ],
            out_specs=pl.BlockSpec((bc, S, D), pb),
        ),
        compiler_params=pltpu.CompilerParams(
            dimension_semantics=("parallel",),
        ),
    )(
        text_len.astype(jnp.int32),
        patches, text_emb,
        params["patch_w"], params["patch_b"].reshape(1, D), params["pos_emb"],
        attn_w, attn_ut, attn_bo,
        params["w1"], params["b1"].reshape(1, FFN_DIM),
        params["w2"], params["b2"].reshape(1, D),
        params["ln1_g"].reshape(1, D), params["ln1_b"].reshape(1, D),
        params["ln2_g"].reshape(1, D), params["ln2_b"].reshape(1, D),
    )


# ------------------------------ model glue ------------------------------
def init_params(key):
    D = Cfg.encoder_embedding_size
    patch_dim = CHANNELS * Cfg.img_patch_size * Cfg.img_patch_size
    num_patches = (Cfg.diagram_size // Cfg.img_patch_size) ** 2
    keys = jax.random.split(key, 12)

    def nrm(k, shape, s=0.02):
        return jax.random.normal(k, shape, jnp.float32) * s

    return {
        "patch_w": nrm(keys[0], (patch_dim, D)),
        "patch_b": jnp.zeros((D,), jnp.float32),
        # embeddings with padding_idx=0 -> zero row 0
        "tok_emb": nrm(keys[1], (VOCAB, D)).at[0].set(0.0),
        "class_emb": nrm(keys[2], (N_CLASS_TAG, D)).at[0].set(0.0),
        "sect_emb": nrm(keys[3], (N_SECT_TAG, D)).at[0].set(0.0),
        # transformer encoder
        "pos_emb": nrm(keys[4], (num_patches, D)),
        "wq": nrm(keys[5], (D, D)), "bq": jnp.zeros((D,), jnp.float32),
        "wk": nrm(keys[6], (D, D)), "bk": jnp.zeros((D,), jnp.float32),
        "wv": nrm(keys[7], (D, D)), "bv": jnp.zeros((D,), jnp.float32),
        "wo": nrm(keys[8], (D, D)), "bo": jnp.zeros((D,), jnp.float32),
        "w1": nrm(keys[9], (D, FFN_DIM)), "b1": jnp.zeros((FFN_DIM,), jnp.float32),
        "w2": nrm(keys[10], (FFN_DIM, D)), "b2": jnp.zeros((D,), jnp.float32),
        "ln1_g": jnp.ones((D,), jnp.float32), "ln1_b": jnp.zeros((D,), jnp.float32),
        "ln2_g": jnp.ones((D,), jnp.float32), "ln2_b": jnp.zeros((D,), jnp.float32),
    }


def transformer_pretrain_forward(params, diagram_src, text_dict, var_dict):
    B = diagram_src.shape[0]
    p = Cfg.img_patch_size
    C = CHANNELS
    hh = ww = Cfg.diagram_size // p
    num_patches = hh * ww
    patch_dim = C * p * p

    # Rearrange('b c (h p1)(w p2) -> b (h w)(p1 p2 c)')  (cheap XLA glue)
    x = diagram_src.reshape(B, C, hh, p, ww, p)
    x = jnp.transpose(x, (0, 2, 4, 3, 5, 1))
    patches = x.reshape(B, num_patches, patch_dim)

    # TODO(synk): embedding gathers stay in XLA (tiny tables, no vector-gather win worth the
    # lowering risk).  The K-sum and class/sect adds are combined here so the kernel gets a
    # single (B, L, D) text operand (4x less DMA than shipping (B, K, L, D)).
    tok_emb = jnp.take(params["tok_emb"], text_dict["token"], axis=0)          # (B, K, L, D)
    text_emb = (tok_emb.sum(axis=1)
                + jnp.take(params["sect_emb"], text_dict["sect_tag"], axis=0)
                + jnp.take(params["class_emb"], text_dict["class_tag"], axis=0))  # (B, L, D)

    # dropout: eval-mode identity

    transformer_outputs = fused_transformer_pretrain(
        params, patches, text_emb, text_dict["len"]
    )

    len_comb = text_dict["len"] + num_patches
    var_pos_comb = var_dict["pos"] + num_patches
    return transformer_outputs, len_comb, var_pos_comb


# ------------------------------ main ------------------------------
if __name__ == "__main__":
    key = jax.random.PRNGKey(0)
    k1, k2, k3, k4, k5, kp = jax.random.split(key, 6)

    B, L, K = 2, 8, 4
    diagram = jax.random.normal(
        k1, (B, CHANNELS, Cfg.diagram_size, Cfg.diagram_size), jnp.float32
    )
    token = jax.random.randint(k2, (B, K, L), 0, VOCAB, dtype=jnp.int32)
    class_tag = jax.random.randint(k3, (B, L), 0, N_CLASS_TAG, dtype=jnp.int32)
    sect_tag = jax.random.randint(k4, (B, L), 0, N_SECT_TAG, dtype=jnp.int32)
    text_len = jnp.array([8, 5], jnp.int32)
    var_pos = jax.random.randint(k5, (B, 3), 0, L, dtype=jnp.int32)

    params = init_params(kp)
    text_dict = {"token": token, "class_tag": class_tag, "sect_tag": sect_tag, "len": text_len}
    var_dict = {"pos": var_pos}

    fwd = jax.jit(transformer_pretrain_forward)
    out, len_comb, var_pos_comb = fwd(params, diagram, text_dict, var_dict)
    jax.block_until_ready((out, len_comb, var_pos_comb))

    num_patches = (Cfg.diagram_size // Cfg.img_patch_size) ** 2
    assert out.shape == (B, num_patches + L, Cfg.encoder_embedding_size)
    assert len_comb.shape == (B,) and int(len_comb[0]) == 8 + num_patches
    assert var_pos_comb.shape == (B, 3)
    assert bool(jnp.all(jnp.isfinite(out)))
    print("KERNEL_OK")
</pallas_src>

<mosaic_0001>
module attributes {stable_mosaic.version = 11 : i64} {
  func.func @_fused_encoder_kernel(%arg0: i32, %arg1: memref<2xi32, #tpu.memory_space<smem>>, %arg2: memref<1x16x48xf32, #tpu.memory_space<vmem>>, %arg3: memref<1x8x32xf32, #tpu.memory_space<vmem>>, %arg4: memref<48x32xf32, #tpu.memory_space<vmem>>, %arg5: memref<1x32xf32, #tpu.memory_space<vmem>>, %arg6: memref<16x32xf32, #tpu.memory_space<vmem>>, %arg7: memref<32x256xf32, #tpu.memory_space<vmem>>, %arg8: memref<4x32xf32, #tpu.memory_space<vmem>>, %arg9: memref<1x32xf32, #tpu.memory_space<vmem>>, %arg10: memref<32x64xf32, #tpu.memory_space<vmem>>, %arg11: memref<1x64xf32, #tpu.memory_space<vmem>>, %arg12: memref<64x32xf32, #tpu.memory_space<vmem>>, %arg13: memref<1x32xf32, #tpu.memory_space<vmem>>, %arg14: memref<1x32xf32, #tpu.memory_space<vmem>>, %arg15: memref<1x32xf32, #tpu.memory_space<vmem>>, %arg16: memref<1x32xf32, #tpu.memory_space<vmem>>, %arg17: memref<1x32xf32, #tpu.memory_space<vmem>>, %arg18: memref<1x24x32xf32, #tpu.memory_space<vmem>>) attributes {dimension_semantics = [#tpu.dimension_semantics<parallel>], iteration_bounds = array<i64: 2>, scalar_prefetch = 1 : i64, scratch_operands = 0 : i64, tpu.core_type = #tpu.core_type<tc>, window_params = [{transform_indices = @transform_0, window_bounds = array<i64: 1, 16, 48>}, {transform_indices = @transform_1, window_bounds = array<i64: 1, 8, 32>}, {pipeline_mode = #tpu.pipeline_mode<synchronous>, transform_indices = @transform_2, window_bounds = array<i64: 48, 32>}, {pipeline_mode = #tpu.pipeline_mode<synchronous>, transform_indices = @transform_3, window_bounds = array<i64: 1, 32>}, {pipeline_mode = #tpu.pipeline_mode<synchronous>, transform_indices = @transform_4, window_bounds = array<i64: 16, 32>}, {pipeline_mode = #tpu.pipeline_mode<synchronous>, transform_indices = @transform_5, window_bounds = array<i64: 32, 256>}, {pipeline_mode = #tpu.pipeline_mode<synchronous>, transform_indices = @transform_6, window_bounds = array<i64: 4, 32>}, {pipeline_mode = #tpu.pipeline_mode<synchronous>, transform_indices = @transform_7, window_bounds = array<i64: 1, 32>}, {pipeline_mode = #tpu.pipeline_mode<synchronous>, transform_indices = @transform_8, window_bounds = array<i64: 32, 64>}, {pipeline_mode = #tpu.pipeline_mode<synchronous>, transform_indices = @transform_9, window_bounds = array<i64: 1, 64>}, {pipeline_mode = #tpu.pipeline_mode<synchronous>, transform_indices = @transform_10, window_bounds = array<i64: 64, 32>}, {pipeline_mode = #tpu.pipeline_mode<synchronous>, transform_indices = @transform_11, window_bounds = array<i64: 1, 32>}, {pipeline_mode = #tpu.pipeline_mode<synchronous>, transform_indices = @transform_12, window_bounds = array<i64: 1, 32>}, {pipeline_mode = #tpu.pipeline_mode<synchronous>, transform_indices = @transform_13, window_bounds = array<i64: 1, 32>}, {pipeline_mode = #tpu.pipeline_mode<synchronous>, transform_indices = @transform_14, window_bounds = array<i64: 1, 32>}, {pipeline_mode = #tpu.pipeline_mode<synchronous>, transform_indices = @transform_15, window_bounds = array<i64: 1, 32>}, {transform_indices = @transform_16, window_bounds = array<i64: 1, 24, 32>}]} {
    %c1_i32 = arith.constant 1 : i32
    %0 = arith.muli %arg0, %c1_i32 : i32
    %c0 = arith.constant 0 : index
    %c0_0 = arith.constant 0 : index
    %c0_1 = arith.constant 0 : index
    %1 = vector.load %arg2[%c0, %c0_0, %c0_1] : memref<1x16x48xf32, #tpu.memory_space<vmem>>, vector<1x16x48xf32>
    %2 = vector.shape_cast %1 : vector<1x16x48xf32> to vector<16x48xf32>
    %c0_2 = arith.constant 0 : index
    %c0_3 = arith.constant 0 : index
    %3 = vector.load %arg4[%c0_2, %c0_3] : memref<48x32xf32, #tpu.memory_space<vmem>>, vector<48x32xf32>
    %cst = arith.constant dense<0.000000e+00> : vector<16x32xf32>
    %4 = tpu.matmul %2, %3, %cst {dimension_numbers = #tpu.dot_dimension_numbers<[1], [0], [0], [1], [0, 0, 1, 1], [], []>} : vector<16x48xf32>, vector<48x32xf32>, vector<16x32xf32> -> vector<16x32xf32>
    %c0_4 = arith.constant 0 : index
    %c0_5 = arith.constant 0 : index
    %5 = vector.load %arg5[%c0_4, %c0_5] : memref<1x32xf32, #tpu.memory_space<vmem>>, vector<1x32xf32>
    %6 = vector.broadcast %5 : vector<1x32xf32> to vector<16x32xf32>
    %7 = arith.addf %4, %6 : vector<16x32xf32>
    %c0_6 = arith.constant 0 : index
    %c0_7 = arith.constant 0 : index
    %8 = vector.load %arg6[%c0_6, %c0_7] : memref<16x32xf32, #tpu.memory_space<vmem>>, vector<16x32xf32>
    %9 = arith.addf %7, %8 : vector<16x32xf32>
    %c0_8 = arith.constant 0 : index
    %c0_9 = arith.constant 0 : index
    %c0_10 = arith.constant 0 : index
    %10 = vector.load %arg3[%c0_8, %c0_9, %c0_10] : memref<1x8x32xf32, #tpu.memory_space<vmem>>, vector<1x8x32xf32>
    %11 = vector.shape_cast %10 : vector<1x8x32xf32> to vector<8x32xf32>
    %12 = tpu.concatenate %9, %11 in 0 : vector<16x32xf32>, vector<8x32xf32> -> vector<24x32xf32>
    %c0_11 = arith.constant 0 : index
    %c0_12 = arith.constant 0 : index
    %13 = vector.load %arg7[%c0_11, %c0_12] : memref<32x256xf32, #tpu.memory_space<vmem>>, vector<32x256xf32>
    %cst_13 = arith.constant dense<0.000000e+00> : vector<24x256xf32>
    %14 = tpu.matmul %12, %13, %cst_13 {dimension_numbers = #tpu.dot_dimension_numbers<[1], [0], [0], [1], [0, 0, 1, 1], [], []>} : vector<24x32xf32>, vector<32x256xf32>, vector<24x256xf32> -> vector<24x256xf32>
    %15 = tpu.iota {dimensions = array<i32: 1>} : vector<1x24xi32>
    %c0_i32 = arith.constant 0 : i32
    %16 = arith.addi %0, %c0_i32 : i32
    %17 = arith.index_cast %16 : i32 to index
    %18 = memref.load %arg1[%17] : memref<2xi32, #tpu.memory_space<smem>>
    %c16_i32 = arith.constant 16 : i32
    %19 = arith.addi %c16_i32, %18 : i32
    %20 = vector.broadcast %19 : i32 to vector<1x24xi32>
    %21 = arith.cmpi slt, %15, %20 : vector<1x24xi32>
    %cst_14 = arith.constant 0.000000e+00 : f32
    %cst_15 = arith.constant -1.000000e+30 : f32
    %22 = vector.broadcast %cst_14 : f32 to vector<1x24xf32>
    %23 = vector.broadcast %cst_15 : f32 to vector<1x24xf32>
    %24 = arith.select %21, %22, %23 : vector<1x24xi1>, vector<1x24xf32>
    %c0_16 = arith.constant 0 : index
    %c0_17 = arith.constant 0 : index
    %25 = vector.load %arg8[%c0_16, %c0_17] : memref<4x32xf32, #tpu.memory_space<vmem>>, vector<4x32xf32>
    %cst_18 = arith.constant dense<0.000000e+00> : vector<4x24xf32>
    %26 = tpu.matmul %25, %12, %cst_18 {dimension_numbers = #tpu.dot_dimension_numbers<[1], [1], [0], [0], [0, 0, 1, 0], [], []>} : vector<4x32xf32>, vector<24x32xf32>, vector<4x24xf32> -> vector<4x24xf32>
    %27 = vector.broadcast %24 : vector<1x24xf32> to vector<4x24xf32>
    %28 = arith.addf %26, %27 : vector<4x24xf32>
    %29 = vector.extract_strided_slice %14 {offsets = [0, 0], sizes = [24, 32], strides = [1, 1]} : vector<24x256xf32> to vector<24x32xf32>
    %cst_19 = arith.constant dense<0.000000e+00> : vector<24x24xf32>
    %30 = tpu.matmul %29, %12, %cst_19 {dimension_numbers = #tpu.dot_dimension_numbers<[1], [1], [0], [0], [0, 0, 1, 0], [], []>} : vector<24x32xf32>, vector<24x32xf32>, vector<24x24xf32> -> vector<24x24xf32>
    %31 = vector.extract_strided_slice %28 {offsets = [0, 0], sizes = [1, 24], strides = [1, 1]} : vector<4x24xf32> to vector<1x24xf32>
    %32 = vector.broadcast %31 : vector<1x24xf32> to vector<24x24xf32>
    %33 = arith.addf %30, %32 : vector<24x24xf32>
    %cst_20 = arith.constant dense<0xFF800000> : vector<24xf32>
    %34 = vector.multi_reduction <maximumf>, %33, %cst_20 [1] : vector<24x24xf32> to vector<24xf32>
    %35 = vector.shape_cast %34 : vector<24xf32> to vector<24x1xf32>
    %36 = vector.broadcast %35 : vector<24x1xf32> to vector<24x24xf32>
    %37 = arith.subf %33, %36 : vector<24x24xf32>
    %38 = math.exp %37 : vector<24x24xf32>
    %cst_21 = arith.constant dense<0.000000e+00> : vector<24xf32>
    %39 = vector.multi_reduction <add>, %38, %cst_21 [1] : vector<24x24xf32> to vector<24xf32>
    %40 = vector.shape_cast %39 : vector<24xf32> to vector<24x1xf32>
    %41 = tpu.reciprocal %40 {approx = true} : vector<24x1xf32> -> vector<24x1xf32>
    %42 = vector.broadcast %41 : vector<24x1xf32> to vector<24x24xf32>
    %43 = arith.mulf %38, %42 : vector<24x24xf32>
    %44 = vector.extract_strided_slice %14 {offsets = [0, 128], sizes = [24, 32], strides = [1, 1]} : vector<24x256xf32> to vector<24x32xf32>
    %cst_22 = arith.constant dense<0.000000e+00> : vector<24x32xf32>
    %45 = tpu.matmul %43, %44, %cst_22 {dimension_numbers = #tpu.dot_dimension_numbers<[1], [0], [0], [1], [0, 0, 1, 1], [], []>} : vector<24x24xf32>, vector<24x32xf32>, vector<24x32xf32> -> vector<24x32xf32>
    %46 = vector.extract_strided_slice %14 {offsets = [0, 32], sizes = [24, 32], strides = [1, 1]} : vector<24x256xf32> to vector<24x32xf32>
    %cst_23 = arith.constant dense<0.000000e+00> : vector<24x24xf32>
    %47 = tpu.matmul %46, %12, %cst_23 {dimension_numbers = #tpu.dot_dimension_numbers<[1], [1], [0], [0], [0, 0, 1, 0], [], []>} : vector<24x32xf32>, vector<24x32xf32>, vector<24x24xf32> -> vector<24x24xf32>
    %48 = vector.extract_strided_slice %28 {offsets = [1, 0], sizes = [1, 24], strides = [1, 1]} : vector<4x24xf32> to vector<1x24xf32>
    %49 = vector.broadcast %48 : vector<1x24xf32> to vector<24x24xf32>
    %50 = arith.addf %47, %49 : vector<24x24xf32>
    %cst_24 = arith.constant dense<0xFF800000> : vector<24xf32>
    %51 = vector.multi_reduction <maximumf>, %50, %cst_24 [1] : vector<24x24xf32> to vector<24xf32>
    %52 = vector.shape_cast %51 : vector<24xf32> to vector<24x1xf32>
    %53 = vector.broadcast %52 : vector<24x1xf32> to vector<24x24xf32>
    %54 = arith.subf %50, %53 : vector<24x24xf32>
    %55 = math.exp %54 : vector<24x24xf32>
    %cst_25 = arith.constant dense<0.000000e+00> : vector<24xf32>
    %56 = vector.multi_reduction <add>, %55, %cst_25 [1] : vector<24x24xf32> to vector<24xf32>
    %57 = vector.shape_cast %56 : vector<24xf32> to vector<24x1xf32>
    %58 = tpu.reciprocal %57 {approx = true} : vector<24x1xf32> -> vector<24x1xf32>
    %59 = vector.broadcast %58 : vector<24x1xf32> to vector<24x24xf32>
    %60 = arith.mulf %55, %59 : vector<24x24xf32>
    %61 = vector.extract_strided_slice %14 {offsets = [0, 160], sizes = [24, 32], strides = [1, 1]} : vector<24x256xf32> to vector<24x32xf32>
    %cst_26 = arith.constant dense<0.000000e+00> : vector<24x32xf32>
    %62 = tpu.matmul %60, %61, %cst_26 {dimension_numbers = #tpu.dot_dimension_numbers<[1], [0], [0], [1], [0, 0, 1, 1], [], []>} : vector<24x24xf32>, vector<24x32xf32>, vector<24x32xf32> -> vector<24x32xf32>
    %63 = arith.addf %45, %62 : vector<24x32xf32>
    %64 = vector.extract_strided_slice %14 {offsets = [0, 64], sizes = [24, 32], strides = [1, 1]} : vector<24x256xf32> to vector<24x32xf32>
    %cst_27 = arith.constant dense<0.000000e+00> : vector<24x24xf32>
    %65 = tpu.matmul %64, %12, %cst_27 {dimension_numbers = #tpu.dot_dimension_numbers<[1], [1], [0], [0], [0, 0, 1, 0], [], []>} : vector<24x32xf32>, vector<24x32xf32>, vector<24x24xf32> -> vector<24x24xf32>
    %66 = vector.extract_strided_slice %28 {offsets = [2, 0], sizes = [1, 24], strides = [1, 1]} : vector<4x24xf32> to vector<1x24xf32>
    %67 = vector.broadcast %66 : vector<1x24xf32> to vector<24x24xf32>
    %68 = arith.addf %65, %67 : vector<24x24xf32>
    %cst_28 = arith.constant dense<0xFF800000> : vector<24xf32>
    %69 = vector.multi_reduction <maximumf>, %68, %cst_28 [1] : vector<24x24xf32> to vector<24xf32>
    %70 = vector.shape_cast %69 : vector<24xf32> to vector<24x1xf32>
    %71 = vector.broadcast %70 : vector<24x1xf32> to vector<24x24xf32>
    %72 = arith.subf %68, %71 : vector<24x24xf32>
    %73 = math.exp %72 : vector<24x24xf32>
    %cst_29 = arith.constant dense<0.000000e+00> : vector<24xf32>
    %74 = vector.multi_reduction <add>, %73, %cst_29 [1] : vector<24x24xf32> to vector<24xf32>
    %75 = vector.shape_cast %74 : vector<24xf32> to vector<24x1xf32>
    %76 = tpu.reciprocal %75 {approx = true} : vector<24x1xf32> -> vector<24x1xf32>
    %77 = vector.broadcast %76 : vector<24x1xf32> to vector<24x24xf32>
    %78 = arith.mulf %73, %77 : vector<24x24xf32>
    %79 = vector.extract_strided_slice %14 {offsets = [0, 192], sizes = [24, 32], strides = [1, 1]} : vector<24x256xf32> to vector<24x32xf32>
    %cst_30 = arith.constant dense<0.000000e+00> : vector<24x32xf32>
    %80 = tpu.matmul %78, %79, %cst_30 {dimension_numbers = #tpu.dot_dimension_numbers<[1], [0], [0], [1], [0, 0, 1, 1], [], []>} : vector<24x24xf32>, vector<24x32xf32>, vector<24x32xf32> -> vector<24x32xf32>
    %81 = arith.addf %63, %80 : vector<24x32xf32>
    %82 = vector.extract_strided_slice %14 {offsets = [0, 96], sizes = [24, 32], strides = [1, 1]} : vector<24x256xf32> to vector<24x32xf32>
    %cst_31 = arith.constant dense<0.000000e+00> : vector<24x24xf32>
    %83 = tpu.matmul %82, %12, %cst_31 {dimension_numbers = #tpu.dot_dimension_numbers<[1], [1], [0], [0], [0, 0, 1, 0], [], []>} : vector<24x32xf32>, vector<24x32xf32>, vector<24x24xf32> -> vector<24x24xf32>
    %84 = vector.extract_strided_slice %28 {offsets = [3, 0], sizes = [1, 24], strides = [1, 1]} : vector<4x24xf32> to vector<1x24xf32>
    %85 = vector.broadcast %84 : vector<1x24xf32> to vector<24x24xf32>
    %86 = arith.addf %83, %85 : vector<24x24xf32>
    %cst_32 = arith.constant dense<0xFF800000> : vector<24xf32>
    %87 = vector.multi_reduction <maximumf>, %86, %cst_32 [1] : vector<24x24xf32> to vector<24xf32>
    %88 = vector.shape_cast %87 : vector<24xf32> to vector<24x1xf32>
    %89 = vector.broadcast %88 : vector<24x1xf32> to vector<24x24xf32>
    %90 = arith.subf %86, %89 : vector<24x24xf32>
    %91 = math.exp %90 : vector<24x24xf32>
    %cst_33 = arith.constant dense<0.000000e+00> : vector<24xf32>
    %92 = vector.multi_reduction <add>, %91, %cst_33 [1] : vector<24x24xf32> to vector<24xf32>
    %93 = vector.shape_cast %92 : vector<24xf32> to vector<24x1xf32>
    %94 = tpu.reciprocal %93 {approx = true} : vector<24x1xf32> -> vector<24x1xf32>
    %95 = vector.broadcast %94 : vector<24x1xf32> to vector<24x24xf32>
    %96 = arith.mulf %91, %95 : vector<24x24xf32>
    %97 = vector.extract_strided_slice %14 {offsets = [0, 224], sizes = [24, 32], strides = [1, 1]} : vector<24x256xf32> to vector<24x32xf32>
    %cst_34 = arith.constant dense<0.000000e+00> : vector<24x32xf32>
    %98 = tpu.matmul %96, %97, %cst_34 {dimension_numbers = #tpu.dot_dimension_numbers<[1], [0], [0], [1], [0, 0, 1, 1], [], []>} : vector<24x24xf32>, vector<24x32xf32>, vector<24x32xf32> -> vector<24x32xf32>
    %99 = arith.addf %81, %98 : vector<24x32xf32>
    %c0_35 = arith.constant 0 : index
    %c0_36 = arith.constant 0 : index
    %100 = vector.load %arg9[%c0_35, %c0_36] : memref<1x32xf32, #tpu.memory_space<vmem>>, vector<1x32xf32>
    %101 = vector.broadcast %100 : vector<1x32xf32> to vector<24x32xf32>
    %102 = arith.addf %99, %101 : vector<24x32xf32>
    %103 = arith.addf %12, %102 : vector<24x32xf32>
    %cst_37 = arith.constant dense<0.000000e+00> : vector<24xf32>
    %104 = vector.multi_reduction <add>, %103, %cst_37 [1] : vector<24x32xf32> to vector<24xf32>
    %105 = vector.shape_cast %104 : vector<24xf32> to vector<24x1xf32>
    %cst_38 = arith.constant 3.200000e+01 : f32
    %106 = vector.broadcast %cst_38 : f32 to vector<24x1xf32>
    %107 = arith.divf %105, %106 : vector<24x1xf32>
    %108 = vector.broadcast %107 : vector<24x1xf32> to vector<24x32xf32>
    %109 = arith.subf %103, %108 : vector<24x32xf32>
    %110 = arith.mulf %109, %109 : vector<24x32xf32>
    %cst_39 = arith.constant dense<0.000000e+00> : vector<24xf32>
    %111 = vector.multi_reduction <add>, %110, %cst_39 [1] : vector<24x32xf32> to vector<24xf32>
    %112 = vector.shape_cast %111 : vector<24xf32> to vector<24x1xf32>
    %cst_40 = arith.constant 3.200000e+01 : f32
    %113 = vector.broadcast %cst_40 : f32 to vector<24x1xf32>
    %114 = arith.divf %112, %113 : vector<24x1xf32>
    %115 = vector.broadcast %107 : vector<24x1xf32> to vector<24x32xf32>
    %116 = arith.subf %103, %115 : vector<24x32xf32>
    %cst_41 = arith.constant 9.99999974E-6 : f32
    %117 = vector.broadcast %cst_41 : f32 to vector<24x1xf32>
    %118 = arith.addf %114, %117 : vector<24x1xf32>
    %119 = math.rsqrt %118 : vector<24x1xf32>
    %120 = vector.broadcast %119 : vector<24x1xf32> to vector<24x32xf32>
    %121 = arith.mulf %116, %120 : vector<24x32xf32>
    %c0_42 = arith.constant 0 : index
    %c0_43 = arith.constant 0 : index
    %122 = vector.load %arg14[%c0_42, %c0_43] : memref<1x32xf32, #tpu.memory_space<vmem>>, vector<1x32xf32>
    %123 = vector.broadcast %122 : vector<1x32xf32> to vector<24x32xf32>
    %124 = arith.mulf %121, %123 : vector<24x32xf32>
    %c0_44 = arith.constant 0 : index
    %c0_45 = arith.constant 0 : index
    %125 = vector.load %arg15[%c0_44, %c0_45] : memref<1x32xf32, #tpu.memory_space<vmem>>, vector<1x32xf32>
    %126 = vector.broadcast %125 : vector<1x32xf32> to vector<24x32xf32>
    %127 = arith.addf %124, %126 : vector<24x32xf32>
    %c0_46 = arith.constant 0 : index
    %c0_47 = arith.constant 0 : index
    %128 = vector.load %arg10[%c0_46, %c0_47] : memref<32x64xf32, #tpu.memory_space<vmem>>, vector<32x64xf32>
    %cst_48 = arith.constant dense<0.000000e+00> : vector<24x64xf32>
    %129 = tpu.matmul %127, %128, %cst_48 {dimension_numbers = #tpu.dot_dimension_numbers<[1], [0], [0], [1], [0, 0, 1, 1], [], []>} : vector<24x32xf32>, vector<32x64xf32>, vector<24x64xf32> -> vector<24x64xf32>
    %c0_49 = arith.constant 0 : index
    %c0_50 = arith.constant 0 : index
    %130 = vector.load %arg11[%c0_49, %c0_50] : memref<1x64xf32, #tpu.memory_space<vmem>>, vector<1x64xf32>
    %131 = vector.broadcast %130 : vector<1x64xf32> to vector<24x64xf32>
    %132 = arith.addf %129, %131 : vector<24x64xf32>
    %cst_51 = arith.constant 0.000000e+00 : f32
    %133 = vector.broadcast %cst_51 : f32 to vector<24x64xf32>
    %134 = arith.maximumf %132, %133 : vector<24x64xf32>
    %c0_52 = arith.constant 0 : index
    %c0_53 = arith.constant 0 : index
    %135 = vector.load %arg12[%c0_52, %c0_53] : memref<64x32xf32, #tpu.memory_space<vmem>>, vector<64x32xf32>
    %cst_54 = arith.constant dense<0.000000e+00> : vector<24x32xf32>
    %136 = tpu.matmul %134, %135, %cst_54 {dimension_numbers = #tpu.dot_dimension_numbers<[1], [0], [0], [1], [0, 0, 1, 1], [], []>} : vector<24x64xf32>, vector<64x32xf32>, vector<24x32xf32> -> vector<24x32xf32>
    %c0_55 = arith.constant 0 : index
    %c0_56 = arith.constant 0 : index
    %137 = vector.load %arg13[%c0_55, %c0_56] : memref<1x32xf32, #tpu.memory_space<vmem>>, vector<1x32xf32>
    %138 = vector.broadcast %137 : vector<1x32xf32> to vector<24x32xf32>
    %139 = arith.addf %136, %138 : vector<24x32xf32>
    %140 = arith.addf %127, %139 : vector<24x32xf32>
    %cst_57 = arith.constant dense<0.000000e+00> : vector<24xf32>
    %141 = vector.multi_reduction <add>, %140, %cst_57 [1] : vector<24x32xf32> to vector<24xf32>
    %142 = vector.shape_cast %141 : vector<24xf32> to vector<24x1xf32>
    %cst_58 = arith.constant 3.200000e+01 : f32
    %143 = vector.broadcast %cst_58 : f32 to vector<24x1xf32>
    %144 = arith.divf %142, %143 : vector<24x1xf32>
    %145 = vector.broadcast %144 : vector<24x1xf32> to vector<24x32xf32>
    %146 = arith.subf %140, %145 : vector<24x32xf32>
    %147 = arith.mulf %146, %146 : vector<24x32xf32>
    %cst_59 = arith.constant dense<0.000000e+00> : vector<24xf32>
    %148 = vector.multi_reduction <add>, %147, %cst_59 [1] : vector<24x32xf32> to vector<24xf32>
    %149 = vector.shape_cast %148 : vector<24xf32> to vector<24x1xf32>
    %cst_60 = arith.constant 3.200000e+01 : f32
    %150 = vector.broadcast %cst_60 : f32 to vector<24x1xf32>
    %151 = arith.divf %149, %150 : vector<24x1xf32>
    %152 = vector.broadcast %144 : vector<24x1xf32> to vector<24x32xf32>
    %153 = arith.subf %140, %152 : vector<24x32xf32>
    %cst_61 = arith.constant 9.99999974E-6 : f32
    %154 = vector.broadcast %cst_61 : f32 to vector<24x1xf32>
    %155 = arith.addf %151, %154 : vector<24x1xf32>
    %156 = math.rsqrt %155 : vector<24x1xf32>
    %157 = vector.broadcast %156 : vector<24x1xf32> to vector<24x32xf32>
    %158 = arith.mulf %153, %157 : vector<24x32xf32>
    %c0_62 = arith.constant 0 : index
    %c0_63 = arith.constant 0 : index
    %159 = vector.load %arg16[%c0_62, %c0_63] : memref<1x32xf32, #tpu.memory_space<vmem>>, vector<1x32xf32>
    %160 = vector.broadcast %159 : vector<1x32xf32> to vector<24x32xf32>
    %161 = arith.mulf %158, %160 : vector<24x32xf32>
    %c0_64 = arith.constant 0 : index
    %c0_65 = arith.constant 0 : index
    %162 = vector.load %arg17[%c0_64, %c0_65] : memref<1x32xf32, #tpu.memory_space<vmem>>, vector<1x32xf32>
    %163 = vector.broadcast %162 : vector<1x32xf32> to vector<24x32xf32>
    %164 = arith.addf %161, %163 : vector<24x32xf32>
    %c0_66 = arith.constant 0 : index
    %c0_67 = arith.constant 0 : index
    %c0_68 = arith.constant 0 : index
    %165 = vector.load %arg18[%c0_66, %c0_67, %c0_68] : memref<1x24x32xf32, #tpu.memory_space<vmem>>, vector<1x24x32xf32>
    %166 = vector.shape_cast %165 : vector<1x24x32xf32> to vector<24x32xf32>
    %167 = vector.shape_cast %164 : vector<24x32xf32> to vector<1x24x32xf32>
    tpu.vector_store %arg18[%c0_66, %c0_67, %c0_68], %167 {strides = array<i32>} : memref<1x24x32xf32, #tpu.memory_space<vmem>>, vector<1x24x32xf32>,
    return
  }
  func.func @transform_0(%arg0: i32, %arg1: memref<2xi32, #tpu.memory_space<smem>>) -> (i32, i32, i32) {
    %c0_i32 = arith.constant 0 : i32
    %c0_i32_0 = arith.constant 0 : i32
    %c0_i32_1 = arith.constant 0 : i32
    return %arg0, %c0_i32, %c0_i32_0 : i32, i32, i32
  }
  func.func @transform_1(%arg0: i32, %arg1: memref<2xi32, #tpu.memory_space<smem>>) -> (i32, i32, i32) {
    %c0_i32 = arith.constant 0 : i32
    %c0_i32_0 = arith.constant 0 : i32
    %c0_i32_1 = arith.constant 0 : i32
    return %arg0, %c0_i32, %c0_i32_0 : i32, i32, i32
  }
  func.func @transform_2(%arg0: i32, %arg1: memref<2xi32, #tpu.memory_space<smem>>) -> (i32, i32) {
    %c0_i32 = arith.constant 0 : i32
    %c0_i32_0 = arith.constant 0 : i32
    %c0_i32_1 = arith.constant 0 : i32
    return %c0_i32, %c0_i32_0 : i32, i32
  }
  func.func @transform_3(%arg0: i32, %arg1: memref<2xi32, #tpu.memory_space<smem>>) -> (i32, i32) {
    %c0_i32 = arith.constant 0 : i32
    %c0_i32_0 = arith.constant 0 : i32
    %c0_i32_1 = arith.constant 0 : i32
    return %c0_i32, %c0_i32_0 : i32, i32
  }
  func.func @transform_4(%arg0: i32, %arg1: memref<2xi32, #tpu.memory_space<smem>>) -> (i32, i32) {
    %c0_i32 = arith.constant 0 : i32
    %c0_i32_0 = arith.constant 0 : i32
    %c0_i32_1 = arith.constant 0 : i32
    return %c0_i32, %c0_i32_0 : i32, i32
  }
  func.func @transform_5(%arg0: i32, %arg1: memref<2xi32, #tpu.memory_space<smem>>) -> (i32, i32) {
    %c0_i32 = arith.constant 0 : i32
    %c0_i32_0 = arith.constant 0 : i32
    %c0_i32_1 = arith.constant 0 : i32
    return %c0_i32, %c0_i32_0 : i32, i32
  }
  func.func @transform_6(%arg0: i32, %arg1: memref<2xi32, #tpu.memory_space<smem>>) -> (i32, i32) {
    %c0_i32 = arith.constant 0 : i32
    %c0_i32_0 = arith.constant 0 : i32
    %c0_i32_1 = arith.constant 0 : i32
    return %c0_i32, %c0_i32_0 : i32, i32
  }
  func.func @transform_7(%arg0: i32, %arg1: memref<2xi32, #tpu.memory_space<smem>>) -> (i32, i32) {
    %c0_i32 = arith.constant 0 : i32
    %c0_i32_0 = arith.constant 0 : i32
    %c0_i32_1 = arith.constant 0 : i32
    return %c0_i32, %c0_i32_0 : i32, i32
  }
  func.func @transform_8(%arg0: i32, %arg1: memref<2xi32, #tpu.memory_space<smem>>) -> (i32, i32) {
    %c0_i32 = arith.constant 0 : i32
    %c0_i32_0 = arith.constant 0 : i32
    %c0_i32_1 = arith.constant 0 : i32
    return %c0_i32, %c0_i32_0 : i32, i32
  }
  func.func @transform_9(%arg0: i32, %arg1: memref<2xi32, #tpu.memory_space<smem>>) -> (i32, i32) {
    %c0_i32 = arith.constant 0 : i32
    %c0_i32_0 = arith.constant 0 : i32
    %c0_i32_1 = arith.constant 0 : i32
    return %c0_i32, %c0_i32_0 : i32, i32
  }
  func.func @transform_10(%arg0: i32, %arg1: memref<2xi32, #tpu.memory_space<smem>>) -> (i32, i32) {
    %c0_i32 = arith.constant 0 : i32
    %c0_i32_0 = arith.constant 0 : i32
    %c0_i32_1 = arith.constant 0 : i32
    return %c0_i32, %c0_i32_0 : i32, i32
  }
  func.func @transform_11(%arg0: i32, %arg1: memref<2xi32, #tpu.memory_space<smem>>) -> (i32, i32) {
    %c0_i32 = arith.constant 0 : i32
    %c0_i32_0 = arith.constant 0 : i32
    %c0_i32_1 = arith.constant 0 : i32
    return %c0_i32, %c0_i32_0 : i32, i32
  }
  func.func @transform_12(%arg0: i32, %arg1: memref<2xi32, #tpu.memory_space<smem>>) -> (i32, i32) {
    %c0_i32 = arith.constant 0 : i32
    %c0_i32_0 = arith.constant 0 : i32
    %c0_i32_1 = arith.constant 0 : i32
    return %c0_i32, %c0_i32_0 : i32, i32
  }
  func.func @transform_13(%arg0: i32, %arg1: memref<2xi32, #tpu.memory_space<smem>>) -> (i32, i32) {
    %c0_i32 = arith.constant 0 : i32
    %c0_i32_0 = arith.constant 0 : i32
    %c0_i32_1 = arith.constant 0 : i32
    return %c0_i32, %c0_i32_0 : i32, i32
  }
  func.func @transform_14(%arg0: i32, %arg1: memref<2xi32, #tpu.memory_space<smem>>) -> (i32, i32) {
    %c0_i32 = arith.constant 0 : i32
    %c0_i32_0 = arith.constant 0 : i32
    %c0_i32_1 = arith.constant 0 : i32
    return %c0_i32, %c0_i32_0 : i32, i32
  }
  func.func @transform_15(%arg0: i32, %arg1: memref<2xi32, #tpu.memory_space<smem>>) -> (i32, i32) {
    %c0_i32 = arith.constant 0 : i32
    %c0_i32_0 = arith.constant 0 : i32
    %c0_i32_1 = arith.constant 0 : i32
    return %c0_i32, %c0_i32_0 : i32, i32
  }
  func.func @transform_16(%arg0: i32, %arg1: memref<2xi32, #tpu.memory_space<smem>>) -> (i32, i32, i32) {
    %c0_i32 = arith.constant 0 : i32
    %c0_i32_0 = arith.constant 0 : i32
    %c0_i32_1 = arith.constant 0 : i32
    return %arg0, %c0_i32, %c0_i32_0 : i32, i32, i32
  }
}

</mosaic_0001>

<bundles_post_ra>
// kernel: transformer_pretrain_forward.1
= control target key start
LH: loop header
LB: loop body
LE: loop exit
PB: predicated region body
PF: predicated region fallthrough
CT: control target
= control target key end

     0   :  { %s1803_s27 = smov [#allocation3]   ;;  %s2338_s0 = inlined_call_operand.vmem [shape: s32[2], index: 0, kind: input, shape index: {}]   ;;  %s2339_s1 = inlined_call_operand.vmem [shape: f32[2,16,48], index: 1, kind: input, shape index: {}]   ;;  %s2340_s2 = inlined_call_operand.vmem [shape: f32[2,8,32], index: 2, kind: input, shape index: {}]   ;;  %s2341_s3 = inlined_call_operand.vmem [shape: f32[48,32], index: 3, kind: input, shape index: {}]   ;;  %s2342_s4 = inlined_call_operand.vmem [shape: f32[1,32], index: 4, kind: input, shape index: {}]   ;;  %s2343_s5 = inlined_call_operand.vmem [shape: f32[16,32], index: 5, kind: input, shape index: {}]   ;;  %s2344_s6 = inlined_call_operand.vmem [shape: f32[32,256], index: 6, kind: input, shape index: {}]   ;;  %s2345_s7 = inlined_call_operand.vmem [shape: f32[4,32], index: 7, kind: input, shape index: {}]   ;;  %s2346_s8 = inlined_call_operand.vmem [shape: f32[1,32], index: 8, kind: input, shape index: {}]   ;;  %s2347_s9 = inlined_call_operand.vmem [shape: f32[32,64], index: 9, kind: input, shape index: {}]   ;;  %s2348_s10 = inlined_call_operand.vmem [shape: f32[1,64], index: 10, kind: input, shape index: {}]   ;;  %s2349_s11 = inlined_call_operand.vmem [shape: f32[64,32], index: 11, kind: input, shape index: {}]   ;;  %s2350_s12 = inlined_call_operand.vmem [shape: f32[1,32], index: 12, kind: input, shape index: {}]   ;;  %s2351_s13 = inlined_call_operand.vmem [shape: f32[1,32], index: 13, kind: input, shape index: {}]   ;;  %s2352_s14 = inlined_call_operand.vmem [shape: f32[1,32], index: 14, kind: input, shape index: {}]   ;;  %s2353_s15 = inlined_call_operand.vmem [shape: f32[1,32], index: 15, kind: input, shape index: {}]   ;;  %s2354_s16 = inlined_call_operand.vmem [shape: f32[1,32], index: 16, kind: input, shape index: {}]   ;;  %s2355_s17 = inlined_call_operand.hbm [shape: f32[2,24,32], index: 17, kind: output, shape index: {}]  }
   0x1   :  { %2362 = sst [smem:[#allocation14_spill]] %s2338_s0 }
   0x2   :  { %2363 = sst [smem:[#allocation15_spill]] %s2339_s1 }
   0x3   :  { %2364 = sst [smem:[#allocation16_spill]] %s2340_s2 }
   0x4   :  { %2365 = sst [smem:[#allocation17_spill]] %s2348_s10 }
   0x5   :  { %s2366_s26 = sld [smem:[#allocation14_spill]] }
   0xb   :  { %s23_s10 = sshll.u32 %s2366_s26, 4  ;;  %s24_s10 = int_to_ptr.vmem [resolvable:$true] %s23_s10 }
   0xc   :  { %26 = dma.vmem_to_smem %s24_s10, 16, %s1803_s27, [#allocation2] }
   0xd   :  { %1781 = dma.done.wait [#allocation2], 16 }
   0xe   :  { %1782 = vsyncadd [#allocation2], 4294967280 }
   0xf   :  { %29 = sfence }
  0x10   :  { %30 = vsyncpa [#allocation5], 0 }
  0x11   :  { %32 = vsyncpa [#allocation5 + $0x1], 0  ;;  %s1904_s28 = smov 0   ;;  %s1906_s29 = smov 0  }
  0x12   :  { %s1908_s0 = smov 0   ;;  %s1910_s30 = smov 0  }
  0x13 LB: > { %2367 = sst [smem:[#allocation8_spill]] %s1789_s28  ;;  %s1925_s10 = sadd.s32 4294967295, %s1801_s30   ;;  %s1801_s30 = sphi %s1910_s30, %s2381_s30   ;;  %s1797_s0 = sphi %s1908_s0, %s2383_s0   ;;  %s1793_s29 = sphi %s1906_s29, %s2385_s29   ;;  %s1789_s28 = sphi %s1904_s28, %s2384_s28  }
  0x14   : > { %2368 = sst [smem:[#allocation9_spill]] %s1797_s0  ;;  %s1523_s18 = sadd.s32 4294967294, %s1801_s30  }
  0x15   : > { %2369 = sst [smem:[#allocation10_spill]] %s1801_s30  ;;  %s1929_s19 = sadd.s32 1, %s1801_s30  }
  0x16   : > { %2370 = sst [smem:[#allocation11_spill]] %s1929_s19  ;;  %s391_s1 = sadd.s32 1, %s1797_s0 }
  0x17   : > { %s388_s20 = ssub.s32 %s1801_s30, %s1929_s19  ;;  %p401_p0 = scmp.ne.s32.totalorder %s1797_s0, %s1793_s29 }
  0x18   : > { %p389_p1 = scmp.eq.s32.totalorder %s388_s20, 0  ;;  %p402_p2 = scmp.eq.s32.totalorder %s1925_s10, 1 }
  0x19   : > { %p407_p3 = scmp.ne.s32.totalorder %s1793_s29, %s1789_s28  ;;  %p408_p4 = scmp.eq.s32.totalorder %s1523_s18, 1 }
  0x1a   : > { %s1940_s21 = scalar_select %p389_p1, %s1797_s0, %s391_s1  }
  0x1b   : > { %p1942_p5 = por %p402_p2, %p401_p0  ;;  %p1946_p6 = por %p408_p4, %p407_p3 }
  0x1c   : > { %2371 = sst [smem:[#allocation12_spill]] %s1940_s21  ;;  %p1526_p7 = scmp.ge.s32.totalorder %s1801_s30, 1 }
  0x1d   : > { %s2373_s23 = scalar_select %p1946_p6, 1, 0 }
  0x1e   : > { %p483_p8 = scmp.lt.s32.totalorder %s1801_s30, 3 }
  0x1f   : > { %2374 = sst [smem:[#allocation13_spill]] %s2373_s23 }
  0x20   : > { %p484_p9 = pnand %p1526_p7, %p483_p8 }
  0x21   : > { %p537_p10 = scmp.lt.s32.totalorder (!%p484_p9), %s1925_s10, 1  ;;  %s2375_s21 = sld [smem:[#allocation15_spill]] (!%p484_p9) }
  0x22   : > { %487 = sbr.rel (%p484_p9) target bundleno = 2194 (0x892), region = 84  ;;  %s2376_s2 = sld [smem:[#allocation16_spill]] (!%p484_p9) }
  0x23   : > { %s1805_s30 = smov (!%p484_p9), 64   ;;  %s665_s24 = sld [smem:[#allocation3 + %s1925_s10]] (!%p484_p9) }
  0x24   : > { %s1807_s26 = smov (!%p484_p9), 32   ;;  %s2377_s19 = sld [smem:[#allocation17_spill]] (!%p484_p9) }
  0x27   : > { %v553_v0 = vld [vmem:[%s2341_s3 + $0x28] sm:$0xff]  ;;  %v552_v1 = vld [vmem:[%s2341_s3 + $0x20] sm:$0xff]  ;;  %v551_v2 = vld [vmem:[%s2341_s3 + $0x18] sm:$0xff]  ;;  %s538_s20 = scalar_select %p537_p10, %s1925_s10, 1  ;;  %vm558_vm0 = vcmask 392192   ;;  %vm601_vm1 = vcmask 261120   ;;  %v663_v33 = vlaneseq }
  0x28   : > { %575 = vmatpush.msra.mxu0 %v553_v0  ;;  %v599_v3 = vld [vmem:[%s2344_s6 + $0x30] sm:$0xff]  ;;  %v600_v4 = vld [vmem:[%s2344_s6 + $0x38] sm:$0xff]  ;;  %v549_v6 = vld [vmem:[%s2341_s3 + $0x8] sm:$0xff]  ;;  %v1806_v37 = vmov -1e+30   ;;  %vm730_vm3 = vcmask 195584  }
  0x29   : > { %623 = vmatpush.msra.mxu1 %v599_v3  ;;  %v550_v5 = vld [vmem:[%s2341_s3 + $0x10] sm:$0xff]  ;;  %s1587_s27 = sshll.u32 %s538_s20, 4  ;;  %649 = vmatpush.msra.mxu2 %v600_v4  ;;  %v548_v7 = vld [vmem:[%s2341_s3] sm:$0xff]  ;;  %s1529_s25 = sshll.u32 %s538_s20, 3  ;;  %v598_v11 = vld [vmem:[%s2344_s6 + $0x28] sm:$0xff]  ;;  %v664_v35 = vand.u32 127, %v663_v33 }
  0x2a   : > { %576 = vmatpush.msra.mxu0 %v552_v1  ;;  %s541_s28 = scalar_lea.vmem %s2375_s21, %s1587_s27  ;;  %s545_s1 = scalar_lea.vmem %s2376_s2, %s1529_s25  ;;  %v597_v10 = vld [vmem:[%s2344_s6 + $0x20] sm:$0xff]  ;;  %v595_v12 = vld [vmem:[%s2344_s6 + $0x10] sm:$0xff]  ;;  %v596_v13 = vld [vmem:[%s2344_s6 + $0x18] sm:$0xff]  ;;  %vm1311_vm14 = vcmask 523264  }
  0x2b   : > { %v546_v8 = vld [vmem:[%s541_s28] sm:$0xff]  ;;  %v547_v9 = vld [vmem:[%s541_s28 + $0x8] sm:$0xff]  ;;  %624 = vmatpush.msra.mxu1 %v597_v10  ;;  %650 = vmatpush.msra.mxu2 %v598_v11  ;;  %s1804_s20 = smov 96   ;;  %s666_s25 = sadd.s32 16, %s665_s24 }
  0x2c   : > { %577 = vmatpush.msra.mxu0 %v551_v2  ;;  %v1996_v14 = vld [vmem:[%s545_s1] sm:$0xff]  ;;  %v594_v16 = vld [vmem:[%s2344_s6 + $0x8] sm:$0xff]  ;;  %v667_v36 = vstv %s666_s25  ;;  %s1592_s27 = smul.u32 24, %s1925_s10  ;;  %s1757_s1 = scalar_lea.hbm %s2355_s17, 48 }
  0x2d   : > { %625 = vmatpush.msra.mxu1 %v595_v12  ;;  %651 = vmatpush.msra.mxu2 %v596_v13  ;;  %v593_v15 = vld [vmem:[%s2344_s6] sm:$0xff]  ;;  %v589_v23 = vld [vmem:[%s2343_s5 + $0x8] sm:$0xff]  ;;  %vm668_vm2 = vcmp.lt.s32.totalorder %v664_v35, %v667_v36 }
  0x2e   : > { %578 = vmatpush.msra.mxu0 %v550_v5  ;;  %1542 = vmatpush.xpose.msk.msra.mxu3 %vm601_vm1, %v1996_v14  ;;  %v1655_v17 = vld [vmem:[%s2342_s4] ss:$0 sm:$0xff]  ;;  %v669_v38 = vsel %vm668_vm2, 0.0, %v1806_v37 }
  0x2f   : > { %626 = vmatpush.msra.mxu1 %v593_v15  ;;  %652 = vmatpush.msra.mxu2 %v594_v16  ;;  %v588_v19 = vld [vmem:[%s2343_s5] sm:$0xff] }
  0x30   : > { %579 = vmatpush.msra.mxu0 %v549_v6  ;;  %v670_v26 = vld [vmem:[%s2345_s7] sm:$0xf] }
  0x31   : > { %1538 = vmatpush.xpose.msk.msrb.mxu2 %vm601_vm1, %v1996_v14  ;;  %1588 = vmatpush.xpose.msk.msrb.mxu1 %vm601_vm1, %v1996_v14 }
  0x32   : > { %580 = vmatpush.msra.mxu0 %v548_v7 }
  0x33   : > { %1530 = vmatmul.msk.f32.vlgmr.msra.gmra.mxu0 %vm558_vm0, %v546_v8 }
  0x34   : > { %1548 = vmatpush.xpose.msk.msrb.mxu0 %vm601_vm1, %v1996_v14 }
  0x3b   : > { %1531 = vmatmul.msk.f32.gmra.mxu0 %vm558_vm0, %v547_v9 }
  0xb0   : > { %v582_v18 = vpop.f32.mrf.mxu0 }
  0xb1   : > { %v583_v20 = vadd.f32 %v1655_v17, %v582_v18 }
  0xb3   : > { %v2018_v21 = vadd.f32 %v588_v19, %v583_v20 }
  0xb5   : > { %1532 = vmatmul.msk.f32.vlgmr.msra.gmra.mxu1 %vm601_vm1, %v2018_v21  ;;  %1535 = vmatmul.msk.f32.vlgmr.msra.gmra.mxu2 %vm601_vm1, %v2018_v21 }
  0xb8   : > { %v585_v22 = vpop.f32.mrf.mxu0 }
  0xb9   : > { %v586_v24 = vadd.f32 %v1655_v17, %v585_v22 }
  0xbb   : > { %v2027_v25 = vadd.f32 %v589_v23, %v586_v24 }
  0xbd   : > { %1533 = vmatmul.msk.f32.gmra.mxu1 %vm601_vm1, %v2027_v25  ;;  %1536 = vmatmul.msk.f32.gmra.mxu2 %vm601_vm1, %v2027_v25 }
  0xbe   : > { %1539 = vmatpush.xpose.msk.msrb.mxu2 %vm601_vm1, %v2027_v25  ;;  %1543 = vmatpush.xpose.msk.msra.mxu3 %vm601_vm1, %v2027_v25 }
  0xbf   : > { %1549 = vmatpush.xpose.msk.msrb.mxu0 %vm601_vm1, %v2027_v25  ;;  %1589 = vmatpush.xpose.msk.msrb.mxu1 %vm601_vm1, %v2027_v25 }
  0xc2   : > { %1540 = vmatpush.xpose.msk.msrb.mxu2 %vm601_vm1, %v2018_v21  ;;  %1544 = vmatpush.xpose.msk.msra.mxu3 %vm601_vm1, %v2018_v21 }
  0xc3   : > { %1550 = vmatpush.xpose.msk.msrb.mxu0 %vm601_vm1, %v2018_v21  ;;  %1590 = vmatpush.xpose.msk.msrb.mxu1 %vm601_vm1, %v2018_v21 }
  0xc5   : > { %1534 = vmatmul.msk.f32.gmra.mxu1 %vm601_vm1, %v1996_v14  ;;  %1537 = vmatmul.msk.f32.gmra.mxu2 %vm601_vm1, %v1996_v14 }
  0xc6   : > { %1560 = vmatpush.xpose.msk.msrb.mxu3 %vm601_vm1, %v1996_v14 }
  0xca   : > { %1561 = vmatpush.xpose.msk.msrb.mxu3 %vm601_vm1, %v2027_v25 }
  0xcd   : > { %1541 = vmatmul.msk.f32.vlgmr.msrb.gmra.mxu2 %vm601_vm1, %v670_v26 }
  0xce   : > { %1562 = vmatpush.xpose.msk.msrb.mxu3 %vm601_vm1, %v2018_v21 }
 0x132   : > { %v628_v27 = vpop.f32.mrf.mxu1 }
 0x133   : > { %765 = vrot.lane.b32.xlu0 %v628_v27, %s1804_s20  ;;  %1545 = vmatmul.msk.f32.vlgmr.msra.gmra.mxu3 %vm601_vm1, %v628_v27 }
 0x138   : > { %v2065_v28 = vpop.f32.mrf.mxu2 }
 0x13a   : > { %v2067_v29 = vpop.f32.mrf.mxu1 }
 0x13b   : > { %767 = vrot.lane.b32.xlu0 %v2067_v29, %s1804_s20  ;;  %1546 = vmatmul.msk.f32.gmra.mxu3 %vm601_vm1, %v2067_v29 }
 0x140   : > { %v657_v30 = vpop.f32.mrf.mxu2 }
 0x142   : > { %v2073_v31 = vpop.f32.mrf.mxu1 }
 0x143   : > { %919 = vrot.lane.b32.xlu0 %v628_v27, %s1805_s30  ;;  %769 = vrot.lane.b32.xlu1 %v2073_v31, %s1804_s20 }
 0x144   : > { %1547 = vmatmul.msk.f32.gmra.mxu3 %vm601_vm1, %v2073_v31 }
 0x148   : > { %v660_v32 = vpop.f32.mrf.mxu2 }
 0x149   : > { %905 = vmatpush.msra.mxu2 %v660_v32  ;;  %v2101_v57 = vpack.i.bf16 %v657_v30, %v660_v32 }
 0x14b   : > { %906 = vmatpush.msra.mxu2 %v657_v30 }
 0x14d   : > { %907 = vmatpush.msra.mxu2 %v2065_v28 }
 0x150   : > { %v691_v39 = vpop.f32.mrf.mxu2 }
 0x151   : > { %v2084_v41 = vadd.f32 %v691_v39, %v669_v38 }
 0x153   : > { %v2087_v42 = vperm.slane %v2084_v41, 0  ;;  %v764_v47 = vperm.slane %v2084_v41, 1  ;;  %v2112_v63 = vperm.slane %v2084_v41, 2 }
 0x1a5   : > { %v766_v34 = vpop.permute.xlu0 %765 }
 0x1a6   : > { %1551 = vmatmul.msk.f32.vlgmr.msrb.gmra.mxu0 %vm601_vm1, %v766_v34 }
 0x1ad   : > { %v768_v40 = vpop.permute.xlu0 %767 }
 0x1ae   : > { %1552 = vmatmul.msk.f32.gmra.mxu0 %vm601_vm1, %v768_v40 }
 0x1b5   : > { %v920_v43 = vpop.permute.xlu0 %919  ;;  %v770_v44 = vpop.permute.xlu1 %769 }
 0x1b6   : > { %v721_v45 = vpop.f32.mrf.mxu3  ;;  %1553 = vmatmul.msk.f32.vlgmr.msrb.gmra.mxu1 %vm601_vm1, %v770_v44  ;;  %1563 = vmatmul.msk.f32.vlgmr.msrb.gmra.mxu3 %vm601_vm1, %v920_v43 }
 0x1b7   : > { %v2092_v46 = vadd.f32 %v721_v45, %v2087_v42 }
 0x1b9   : > { %v731_v32 = vsel %vm730_vm3, %v2092_v46, -inf }
 0x1be   : > { %v724_v58 = vpop.f32.mrf.mxu3 }
 0x1bf   : > { %v725_v60 = vadd.f32 %v724_v58, %v2087_v42 }
 0x1c1   : > { %v734_v61 = vsel %vm730_vm3, %v725_v60, -inf }
 0x1c7   : > { %v727_v59 = vpop.f32.mrf.mxu3 }
 0x1c8   : > { %v2130_v26 = vadd.f32 %v727_v59, %v2087_v42 }
 0x1ca   : > { %v737_v30 = vsel %vm730_vm3, %v2130_v26, -inf }
 0x223   : > { %v794_v48 = vpop.f32.mrf.mxu0 }
 0x224   : > { %v795_v49 = vadd.f32 %v794_v48, %v764_v47 }
 0x226   : > { %v803_v50 = vsel %vm730_vm3, %v795_v49, -inf }
 0x227   : > { %804 = vmax.xlane.f32.xlu1 %v803_v50 }
 0x22b   : > { %v797_v51 = vpop.f32.mrf.mxu0 }
 0x22c   : > { %v798_v52 = vadd.f32 %v797_v51, %v764_v47 }
 0x22e   : > { %v806_v53 = vsel %vm730_vm3, %v798_v52, -inf }
 0x22f   : > { %807 = vmax.xlane.f32.xlu2 %v806_v53 }
 0x233   : > { %v800_v54 = vpop.f32.mrf.mxu1 }
 0x234   : > { %v801_v55 = vadd.f32 %v800_v54, %v764_v47 }
 0x236   : > { %v809_v56 = vsel %vm730_vm3, %v801_v55, -inf }
 0x237   : > { %810 = vmax.xlane.f32.xlu2 %v809_v56 }
 0x239   : > { %v948_v62 = vpop.f32.mrf.mxu3 }
 0x23a   : > { %v949_v0 = vadd.f32 %v948_v62, %v2112_v63 }
 0x23c   : > { %v957_v1 = vsel %vm730_vm3, %v949_v0, -inf }
 0x240   : > { %839 = vrot.lane.b32.xlu1 %v2065_v28, %s1804_s20 }
 0x248   : > { %1038 = vrot.lane.b32.xlu1 %v628_v27, %s1807_s26 }
 0x24f   : > { %1641 = vrot.lane.b32.xlu2 %v2101_v57, %s1804_s20 }
 0x250   : > { %1040 = vrot.lane.b32.xlu1 %v2067_v29, %s1807_s26 }
 0x258   : > { %1042 = vrot.lane.b32.xlu1 %v2073_v31, %s1807_s26 }
 0x282   : > { %735 = vmax.xlane.f32.xlu1 %v734_v61 }
 0x28a   : > { %958 = vmax.xlane.f32.xlu1 %v957_v1 }
 0x29a   : > { %v805_v2 = vpop.xlane.xlu1 %804 }
 0x29b   : > { %v812_v3 = vsub.f32 %v795_v49, %v805_v2 }
 0x29d   : > { %v815_v4 = vmul.f32 1.442695, %v812_v3 }
 0x29f   : > { %1663 = vpow2.f32 %v815_v4 }
 0x2a2   : > { %v808_v5 = vpop.xlane.xlu2 %807 }
 0x2a3   : > { %v813_v6 = vsub.f32 %v798_v52, %v808_v5 }
 0x2a5   : > { %v1664_v7 = vpop.eup %1663  ;;  %v817_v8 = vmul.f32 1.442695, %v813_v6 }
 0x2a6   : > { %v821_v9 = vsel %vm730_vm3, %v1664_v7, 0.0 }
 0x2a7   : > { %1665 = vpow2.f32 %v817_v8  ;;  %822 = vadd.xlane.f32.xlu0 %v821_v9 }
 0x2aa   : > { %v811_v10 = vpop.xlane.xlu2 %810 }
 0x2ab   : > { %v814_v11 = vsub.f32 %v801_v55, %v811_v10 }
 0x2ad   : > { %v1666_v12 = vpop.eup %1665  ;;  %v819_v13 = vmul.f32 1.442695, %v814_v11 }
 0x2ae   : > { %v824_v15 = vsel %vm730_vm3, %v1666_v12, 0.0 }
 0x2af   : > { %1667 = vpow2.f32 %v819_v13  ;;  %825 = vadd.xlane.f32.xlu2 %v824_v15 }
 0x2b2   : > { %v1642_v16 = vpop.permute.xlu2 %1641  ;;  %v840_v22 = vpop.permute.xlu1 %839 }
 0x2b3   : > { %v1643_v17 = vunpack.i.l.bf16 %v1642_v16  ;;  %v1644_v19 = vunpack.i.h.bf16 %v1642_v16  ;;  %v1037_v16 = vperm.slane %v2084_v41, 3 }
 0x2b5   : > { %v1668_v18 = vpop.eup %1667  ;;  %870 = vmatpush.msra.mxu1 %v1643_v17 }
 0x2b6   : > { %v827_v20 = vsel %vm730_vm3, %v1668_v18, 0.0 }
 0x2b7   : > { %871 = vmatpush.msra.mxu1 %v1644_v19  ;;  %828 = vadd.xlane.f32.xlu0 %v827_v20 }
 0x2b9   : > { %872 = vmatpush.msra.mxu1 %v840_v22 }
 0x2ba   : > { %v1039_v23 = vpop.permute.xlu1 %1038 }
 0x2bb   : > { %1569 = vmatpush.xpose.msk.msrb.mxu1 %vm601_vm1, %v1996_v14 }
 0x2bf   : > { %1570 = vmatpush.xpose.msk.msrb.mxu1 %vm601_vm1, %v2027_v25 }
 0x2c2   : > { %v1041_v24 = vpop.permute.xlu1 %1040 }
 0x2c3   : > { %1571 = vmatpush.xpose.msk.msrb.mxu1 %vm601_vm1, %v2018_v21 }
 0x2c7   : > { %921 = vrot.lane.b32.xlu2 %v2067_v29, %s1805_s30 }
 0x2ca   : > { %v1043_v27 = vpop.permute.xlu1 %1042 }
 0x2cb   : > { %923 = vrot.lane.b32.xlu0 %v2073_v31, %s1805_s30 }
 0x2f0   : > { %738 = vmax.xlane.f32.xlu2 %v737_v30 }
 0x2f5   : > { %732 = vmax.xlane.f32.xlu0 %v731_v32  ;;  %v736_v33 = vpop.xlane.xlu1 %735 }
 0x2f6   : > { %v741_v34 = vsub.f32 %v725_v60, %v736_v33 }
 0x2f8   : > { %v745_v29 = vmul.f32 1.442695, %v741_v34 }
 0x2fa   : > { %1669 = vpow2.f32 %v745_v29 }
 0x2fd   : > { %v959_v35 = vpop.xlane.xlu1 %958 }
 0x2fe   : > { %v966_v31 = vsub.f32 %v949_v0, %v959_v35 }
 0x300   : > { %v2136_v36 = vpop.eup %1669  ;;  %v969_v37 = vmul.f32 1.442695, %v966_v31 }
 0x301   : > { %v752_v38 = vsel %vm730_vm3, %v2136_v36, 0.0 }
 0x302   : > { %1671 = vpow2.f32 %v969_v37  ;;  %753 = vadd.xlane.f32.xlu1 %v752_v38 }
 0x308   : > { %v2140_v39 = vpop.eup %1671 }
 0x309   : > { %v975_v40 = vsel %vm730_vm3, %v2140_v39, 0.0 }
 0x30a   : > { %976 = vadd.xlane.f32.xlu1 %v975_v40 }
 0x31a   : > { %v823_v42 = vpop.xlane.xlu0 %822 }
 0x31b   : > { %1673 = vrcp.f32 %v823_v42 }
 0x321   : > { %v1674_v43 = vpop.eup %1673 }
 0x322   : > { %v833_v44 = vmul.f32 %v1674_v43, %v1664_v7  ;;  %v826_v45 = vpop.xlane.xlu2 %825 }
 0x323   : > { %1675 = vrcp.f32 %v826_v45  ;;  %1651 = vrot.lane.b32.xlu1 %v2101_v57, %s1805_s30 }
 0x324   : > { %1554 = vmatmul.msk.f32.vlgmr.msra.gmra.mxu1 %vm730_vm3, %v833_v44 }
 0x329   : > { %v1676_v47 = vpop.eup %1675 }
 0x32a   : > { %v922_v48 = vpop.permute.xlu2 %921  ;;  %v829_v49 = vpop.xlane.xlu0 %828  ;;  %v834_v50 = vmul.f32 %v1676_v47, %v1666_v12 }
 0x32b   : > { %1677 = vrcp.f32 %v829_v49  ;;  %1564 = vmatmul.msk.f32.gmra.mxu3 %vm601_vm1, %v922_v48 }
 0x32c   : > { %1555 = vmatmul.msk.f32.gmra.mxu1 %vm730_vm3, %v834_v50 }
 0x331   : > { %v1678_v51 = vpop.eup %1677 }
 0x332   : > { %v835_v52 = vmul.f32 %v1678_v51, %v1668_v18 }
 0x334   : > { %1556 = vmatmul.msk.f32.gmra.mxu1 %vm730_vm3, %v835_v52 }
 0x33c   : > { %1572 = vmatmul.msk.f32.vlgmr.msrb.gmra.mxu1 %vm601_vm1, %v1039_v23 }
 0x33d   : > { %v924_v53 = vpop.permute.xlu0 %923 }
 0x33e   : > { %1565 = vmatmul.msk.f32.gmra.mxu3 %vm601_vm1, %v924_v53 }
 0x344   : > { %1573 = vmatmul.msk.f32.gmra.mxu1 %vm601_vm1, %v1041_v24 }
 0x34c   : > { %1574 = vmatmul.msk.f32.gmra.mxu1 %vm601_vm1, %v1043_v27 }
 0x363   : > { %v739_v7 = vpop.xlane.xlu2 %738 }
 0x368   : > { %v733_v61 = vpop.xlane.xlu0 %732 }
 0x369   : > { %v740_v62 = vsub.f32 %v2092_v46, %v733_v61  ;;  %v742_v46 = vsub.f32 %v2130_v26, %v739_v7 }
 0x36b   : > { %v743_v1 = vmul.f32 1.442695, %v740_v62  ;;  %v747_v10 = vmul.f32 1.442695, %v742_v46 }
 0x36d   : > { %1679 = vpow2.f32 %v743_v1 }
 0x36e   : > { %1681 = vpow2.f32 %v747_v10 }
 0x373   : > { %v1680_v6 = vpop.eup %1679 }
 0x374   : > { %v749_v9 = vsel %vm730_vm3, %v1680_v6, 0.0  ;;  %v1682_v17 = vpop.eup %1681 }
 0x375   : > { %v754_v54 = vpop.xlane.xlu1 %753  ;;  %v755_v22 = vsel %vm730_vm3, %v1682_v17, 0.0 }
 0x37d   : > { %v2154_v55 = vpop.xlane.xlu1 %976 }
 0x395   : > { %v1652_v56 = vpop.permute.xlu1 %1651 }
 0x396   : > { %v1653_v58 = vunpack.i.l.bf16 %v1652_v56  ;;  %v1654_v59 = vunpack.i.h.bf16 %v1652_v56 }
 0x398   : > { %1021 = vmatpush.msra.mxu0 %v1653_v58 }
 0x39a   : > { %1022 = vmatpush.msra.mxu0 %v1654_v59 }
 0x3a1   : > { %v2156_v60 = vpop.f32.mrf.mxu1 }
 0x3a9   : > { %v2159_v0 = vpop.f32.mrf.mxu1 }
 0x3ae   : > { %v951_v2 = vpop.f32.mrf.mxu3 }
 0x3af   : > { %v952_v3 = vadd.f32 %v951_v2, %v2112_v63 }
 0x3b1   : > { %v2162_v4 = vpop.f32.mrf.mxu1  ;;  %v960_v5 = vsel %vm730_vm3, %v952_v3, -inf }
 0x3b2   : > { %961 = vmax.xlane.f32.xlu2 %v960_v5 }
 0x3b9   : > { %v1067_v8 = vpop.f32.mrf.mxu1 }
 0x3ba   : > { %750 = vadd.xlane.f32.xlu2 %v749_v9  ;;  %v1068_v23 = vadd.f32 %v1067_v8, %v1037_v16 }
 0x3c1   : > { %v954_v11 = vpop.f32.mrf.mxu3  ;;  %v1070_v12 = vpop.f32.mrf.mxu1 }
 0x3c2   : > { %v955_v13 = vadd.f32 %v954_v11, %v2112_v63  ;;  %v1076_v63 = vsel %vm730_vm3, %v1068_v23, -inf  ;;  %v1071_v24 = vadd.f32 %v1070_v12, %v1037_v16 }
 0x3c4   : > { %v963_v15 = vsel %vm730_vm3, %v955_v13, -inf  ;;  %v1079_v26 = vsel %vm730_vm3, %v1071_v24, -inf }
 0x3c5   : > { %964 = vmax.xlane.f32.xlu0 %v963_v15 }
 0x3c9   : > { %v1073_v18 = vpop.f32.mrf.mxu1 }
 0x3ca   : > { %v1074_v19 = vadd.f32 %v1073_v18, %v1037_v16 }
 0x3cc   : > { %v1082_v20 = vsel %vm730_vm3, %v1074_v19, -inf }
 0x3cd   : > { %1083 = vmax.xlane.f32.xlu1 %v1082_v20  ;;  %756 = vadd.xlane.f32.xlu0 %v755_v22 }
 0x3d2   : > { %1109 = vrot.lane.b32.xlu2 %v2065_v28, %s1807_s26 }
 0x3d5   : > { %1077 = vmax.xlane.f32.xlu0 %v1076_v63 }
 0x3dd   : > { %1080 = vmax.xlane.f32.xlu0 %v1079_v26 }
 0x3e6   : > { %990 = vrot.lane.b32.xlu1 %v2065_v28, %s1805_s30  ;;  %s534_s30 = sand.u32 1, %s1793_s29  }
 0x3e7   : > { %s1434_s10 = scalar_lea.sflag [#allocation5], %s534_s30 }
 0x3f1   : > { %1646 = vrot.lane.b32.xlu0 %v2101_v57, %s1807_s26  ;;  %s1591_s26 = smul.u32 24, %s534_s30 }
 0x3f3   : > { %s536_s23 = scalar_lea.vmem [#allocation4], %s1591_s26 }
 0x3f4   : > { %s1446_s28 = sshll.u32 %s536_s23, 4  ;;  %s1447_s28 = int_to_ptr.vmem [resolvable:$true] %s1446_s28 }
 0x425   : > { %v962_v41 = vpop.xlane.xlu2 %961 }
 0x426   : > { %v967_v27 = vsub.f32 %v952_v3, %v962_v41 }
 0x428   : > { %v971_v30 = vmul.f32 1.442695, %v967_v27 }
 0x42a   : > { %1683 = vpow2.f32 %v971_v30 }
 0x42d   : > { %v751_v32 = vpop.xlane.xlu2 %750 }
 0x42e   : > { %1685 = vrcp.f32 %v751_v32  ;;  %v1656_v32 = vld [vmem:[%s2346_s8] ss:$0 sm:$0xff] }
 0x42f   : > { %1687 = vrcp.f32 %v754_v54 }
 0x430   : > { %v1684_v33 = vpop.eup %1683 }
 0x431   : > { %v978_v34 = vsel %vm730_vm3, %v1684_v33, 0.0 }
 0x432   : > { %979 = vadd.xlane.f32.xlu0 %v978_v34 }
 0x434   : > { %v1686_v29 = vpop.eup %1685 }
 0x435   : > { %v761_v35 = vmul.f32 %v1686_v29, %v1680_v6  ;;  %v1688_v37 = vpop.eup %1687  ;;  %v1110_v8 = vpop.permute.xlu2 %1109 }
 0x436   : > { %v762_v57 = vmul.f32 %v1688_v37, %v2136_v36 }
 0x437   : > { %1557 = vmatmul.msk.f32.vlgmr.msra.gmra.mxu2 %vm730_vm3, %v761_v35 }
 0x438   : > { %v965_v31 = vpop.xlane.xlu0 %964 }
 0x439   : > { %v968_v28 = vsub.f32 %v955_v13, %v965_v31 }
 0x43b   : > { %v973_v38 = vmul.f32 1.442695, %v968_v28 }
 0x43d   : > { %1689 = vpow2.f32 %v973_v38 }
 0x43f   : > { %1558 = vmatmul.msk.f32.gmra.mxu2 %vm730_vm3, %v762_v57 }
 0x440   : > { %v757_v40 = vpop.xlane.xlu0 %756  ;;  %v1084_v50 = vpop.xlane.xlu1 %1083 }
 0x441   : > { %1691 = vrcp.f32 %v757_v40  ;;  %v1087_v53 = vsub.f32 %v1074_v19, %v1084_v50 }
 0x443   : > { %v1690_v42 = vpop.eup %1689  ;;  %v1092_v59 = vmul.f32 1.442695, %v1087_v53 }
 0x444   : > { %v981_v43 = vsel %vm730_vm3, %v1690_v42, 0.0 }
 0x445   : > { %982 = vadd.xlane.f32.xlu1 %v981_v43 }
 0x447   : > { %v1692_v44 = vpop.eup %1691 }
 0x448   : > { %v1078_v45 = vpop.xlane.xlu0 %1077  ;;  %v763_v47 = vmul.f32 %v1692_v44, %v1682_v17 }
 0x449   : > { %v1085_v48 = vsub.f32 %v1068_v23, %v1078_v45 }
 0x44a   : > { %1559 = vmatmul.msk.f32.gmra.mxu2 %vm730_vm3, %v763_v47 }
 0x44b   : > { %v1088_v49 = vmul.f32 1.442695, %v1085_v48 }
 0x44d   : > { %1693 = vpow2.f32 %v1088_v49 }
 0x44e   : > { %1695 = vrcp.f32 %v2154_v55 }
 0x450   : > { %v1081_v36 = vpop.xlane.xlu0 %1080 }
 0x451   : > { %v1086_v51 = vsub.f32 %v1071_v24, %v1081_v36  ;;  %v1808_v36 = vmov 32.0  }
 0x453   : > { %v1694_v52 = vpop.eup %1693  ;;  %v1090_v54 = vmul.f32 1.442695, %v1086_v51 }
 0x454   : > { %v1094_v56 = vsel %vm730_vm3, %v1694_v52, 0.0  ;;  %v1696_v58 = vpop.eup %1695 }
 0x455   : > { %1697 = vpow2.f32 %v1090_v54  ;;  %1095 = vadd.xlane.f32.xlu2 %v1094_v56  ;;  %v987_v61 = vmul.f32 %v1696_v58, %v2140_v39 }
 0x456   : > { %1699 = vpow2.f32 %v1092_v59 }
 0x458   : > { %v991_v62 = vpop.permute.xlu1 %990 }
 0x459   : > { %1023 = vmatpush.msra.mxu0 %v991_v62 }
 0x45a   : > { %1566 = vmatmul.msk.f32.vlgmr.msra.gmra.mxu0 %vm730_vm3, %v987_v61 }
 0x45b   : > { %v1698_v1 = vpop.eup %1697 }
 0x45c   : > { %v1097_v55 = vsel %vm730_vm3, %v1698_v1, 0.0  ;;  %v1700_v2 = vpop.eup %1699 }
 0x45d   : > { %1098 = vadd.xlane.f32.xlu2 %v1097_v55  ;;  %v1100_v6 = vsel %vm730_vm3, %v1700_v2, 0.0 }
 0x463   : > { %v1647_v3 = vpop.permute.xlu0 %1646 }
 0x464   : > { %v1648_v5 = vunpack.i.l.bf16 %v1647_v3  ;;  %v1649_v7 = vunpack.i.h.bf16 %v1647_v3 }
 0x465   : > { %1101 = vadd.xlane.f32.xlu2 %v1100_v6 }
 0x466   : > { %1140 = vmatpush.msrb.mxu2 %v1648_v5 }
 0x468   : > { %1141 = vmatpush.msrb.mxu2 %v1649_v7 }
 0x46a   : > { %1142 = vmatpush.msrb.mxu2 %v1110_v8 }
 0x4a5   : > { %v980_v39 = vpop.xlane.xlu0 %979 }
 0x4a6   : > { %1701 = vrcp.f32 %v980_v39 }
 0x4ac   : > { %v1702_v9 = vpop.eup %1701 }
 0x4ad   : > { %v988_v46 = vmul.f32 %v1702_v9, %v1684_v33  ;;  %v1256_v9 = vld [vmem:[%s2347_s9 + $0x18] sm:$0xff] }
 0x4ae   : > { %1282 = vmatpush.msra.mxu3 %v1256_v9  ;;  %v1660_v9 = vld [vmem:[%s2350_s12] ss:$0 sm:$0xff] }
 0x4af   : > { %1567 = vmatmul.msk.f32.gmra.mxu0 %vm730_vm3, %v988_v46  ;;  %v1255_v46 = vld [vmem:[%s2347_s9 + $0x10] sm:$0xff] }
 0x4b0   : > { %1283 = vmatpush.msra.mxu3 %v1255_v46 }
 0x4b8   : > { %v983_v10 = vpop.xlane.xlu1 %982 }
 0x4b9   : > { %1703 = vrcp.f32 %v983_v10  ;;  %v1254_v10 = vld [vmem:[%s2347_s9 + $0x8] sm:$0xff] }
 0x4ba   : > { %v909_v63 = vpop.f32.mrf.mxu2  ;;  %1284 = vmatpush.msra.mxu3 %v1254_v10 }
 0x4bb   : > { %v910_v27 = vadd.f32 %v909_v63, %v2156_v60 }
 0x4bf   : > { %v1704_v11 = vpop.eup %1703 }
 0x4c0   : > { %v989_v12 = vmul.f32 %v1704_v11, %v1690_v42  ;;  %v1253_v11 = vld [vmem:[%s2347_s9] sm:$0xff] }
 0x4c1   : > { %1285 = vmatpush.msra.mxu3 %v1253_v11 }
 0x4c2   : > { %1568 = vmatmul.msk.f32.gmra.mxu0 %vm730_vm3, %v989_v12  ;;  %v912_v24 = vpop.f32.mrf.mxu2 }
 0x4c3   : > { %v913_v31 = vadd.f32 %v912_v24, %v2159_v0  ;;  %v1304_v24 = vld [vmem:[%s2349_s11 + $0x28] sm:$0xff] }
 0x4c8   : > { %v1096_v13 = vpop.xlane.xlu2 %1095 }
 0x4c9   : > { %1705 = vrcp.f32 %v1096_v13 }
 0x4cd   : > { %v915_v26 = vpop.f32.mrf.mxu2 }
 0x4ce   : > { %v916_v43 = vadd.f32 %v915_v26, %v2162_v4 }
 0x4cf   : > { %v1706_v15 = vpop.eup %1705 }
 0x4d0   : > { %v1106_v16 = vmul.f32 %v1706_v15, %v1694_v52  ;;  %v1099_v17 = vpop.xlane.xlu2 %1098 }
 0x4d1   : > { %1707 = vrcp.f32 %v1099_v17 }
 0x4d2   : > { %1575 = vmatmul.msk.f32.vlgmr.msrb.gmra.mxu2 %vm730_vm3, %v1106_v16 }
 0x4d7   : > { %v1708_v18 = vpop.eup %1707  ;;  %v1025_v41 = vpop.f32.mrf.mxu0 }
 0x4d8   : > { %v1102_v19 = vpop.xlane.xlu2 %1101  ;;  %v1107_v20 = vmul.f32 %v1708_v18, %v1698_v1  ;;  %v1034_v30 = vadd.f32 %v1025_v41, %v910_v27 }
 0x4d9   : > { %1709 = vrcp.f32 %v1102_v19 }
 0x4da   : > { %1576 = vmatmul.msk.f32.gmra.mxu2 %vm730_vm3, %v1107_v20  ;;  %1711 = vrcp.f32 %v1808_v36 }
 0x4df   : > { %v1710_v22 = vpop.eup %1709 }
 0x4e0   : > { %v1108_v23 = vmul.f32 %v1710_v22, %v1700_v2  ;;  %v1712_v51 = vpop.eup %1711  ;;  %v1306_v22 = vld [vmem:[%s2349_s11 + $0x38] sm:$0xff] }
 0x4e1   : > { %v1176_v52 = vmul.f32 32.0, %v1712_v51  ;;  %vm1180_vm4 = vweird.f32 %v1712_v51  ;;  %1329 = vmatpush.msrb.mxu0 %v1306_v22 }
 0x4e2   : > { %1577 = vmatmul.msk.f32.gmra.mxu2 %vm730_vm3, %v1108_v23  ;;  %v1305_v23 = vld [vmem:[%s2349_s11 + $0x30] sm:$0xff] }
 0x4e3   : > { %v1177_v53 = vsub.f32 1.0, %v1176_v52  ;;  %1330 = vmatpush.msrb.mxu0 %v1305_v23 }
 0x4e5   : > { %v1178_v4 = vmul.f32 %v1712_v51, %v1177_v53  ;;  %1331 = vmatpush.msrb.mxu0 %v1304_v24 }
 0x4e7   : > { %v1179_v54 = vadd.f32 %v1712_v51, %v1178_v4 }
 0x52c   : > { %v1028_v35 = vpop.f32.mrf.mxu0 }
 0x52d   : > { %v1035_v37 = vadd.f32 %v1028_v35, %v913_v31 }
 0x53f   : > { %v1031_v42 = vpop.f32.mrf.mxu0 }
 0x540   : > { %v1036_v45 = vadd.f32 %v1031_v42, %v916_v43  ;;  %v1300_v42 = vld [vmem:[%s2349_s11 + $0x8] sm:$0xff] }
 0x555   : > { %v1144_v33 = vpop.f32.mrf.mxu2 }
 0x556   : > { %v1153_v34 = vadd.f32 %v1144_v33, %v1034_v30  ;;  %v1303_v30 = vld [vmem:[%s2349_s11 + $0x20] sm:$0xff] }
 0x557   : > { %1332 = vmatpush.msrb.mxu0 %v1303_v30 }
 0x558   : > { %v1160_v29 = vadd.f32 %v1656_v32, %v1153_v34 }
 0x55a   : > { %v1163_v28 = vadd.f32 %v1160_v29, %v2018_v21  ;;  %v1302_v29 = vld [vmem:[%s2349_s11 + $0x18] sm:$0xff] }
 0x55b   : > { %1333 = vmatpush.msrb.mxu0 %v1302_v29 }
 0x55c   : > { %v1166_v38 = vsel %vm601_vm1, %v1163_v28, 0.0 }
 0x55d   : > { %1167 = vadd.xlane.f32.xlu0 %v1166_v38  ;;  %v1147_v57 = vpop.f32.mrf.mxu2 }
 0x55e   : > { %v1154_v40 = vadd.f32 %v1147_v57, %v1035_v37  ;;  %v1301_v37 = vld [vmem:[%s2349_s11 + $0x10] sm:$0xff] }
 0x55f   : > { %1334 = vmatpush.msrb.mxu0 %v1301_v37 }
 0x560   : > { %v1161_v60 = vadd.f32 %v1656_v32, %v1154_v40 }
 0x561   : > { %1335 = vmatpush.msrb.mxu0 %v1300_v42 }
 0x562   : > { %v1164_v44 = vadd.f32 %v1161_v60, %v2027_v25  ;;  %v2209_v25 = vsel %vm1180_vm4, %v1712_v51, %v1179_v54  ;;  %v1658_v60 = vld [vmem:[%s2352_s14] ss:$0 sm:$0xff] }
 0x564   : > { %v1169_v47 = vsel %vm601_vm1, %v1164_v44, 0.0 }
 0x565   : > { %1170 = vadd.xlane.f32.xlu0 %v1169_v47  ;;  %v1150_v48 = vpop.f32.mrf.mxu2 }
 0x566   : > { %v1155_v0 = vadd.f32 %v1150_v48, %v1036_v45 }
 0x568   : > { %v1162_v49 = vadd.f32 %v1656_v32, %v1155_v0 }
 0x56a   : > { %v1165_v21 = vadd.f32 %v1162_v49, %v1996_v14 }
 0x56c   : > { %v1172_v50 = vsel %vm601_vm1, %v1165_v21, 0.0 }
 0x56d   : > { %1173 = vadd.xlane.f32.xlu2 %v1172_v50 }
 0x5d0   : > { %v1168_v56 = vpop.xlane.xlu0 %1167 }
 0x5d1   : > { %v1182_v58 = vmul.f32 %v2209_v25, %v1168_v56 }
 0x5d3   : > { %v1185_v59 = vsub.f32 %v1163_v28, %v1182_v58  ;;  %v1657_v28 = vld [vmem:[%s2351_s13] ss:$0 sm:$0xff] }
 0x5d5   : > { %v1188_v61 = vmul.f32 %v1185_v59, %v1185_v59 }
 0x5d7   : > { %v1191_v14 = vsel %vm601_vm1, %v1188_v61, 0.0 }
 0x5d8   : > { %1192 = vadd.xlane.f32.xlu0 %v1191_v14  ;;  %v1171_v62 = vpop.xlane.xlu0 %1170  ;;  %v1299_v14 = vld [vmem:[%s2349_s11] sm:$0xff] }
 0x5d9   : > { %v1183_v1 = vmul.f32 %v2209_v25, %v1171_v62  ;;  %1336 = vmatpush.msrb.mxu0 %v1299_v14  ;;  %v1659_v62 = vld [vmem:[%s2377_s19] ss:$0 sm:$0xff]  ;;  %s1445_s19 = scalar_lea.hbm %s2355_s17, %s1592_s27 }
 0x5da   : > { %s1448_s20 = sshll.u32 %s1445_s19, 4  ;;  %s1449_s20 = int_to_ptr.hbm [resolvable:$true] %s1448_s20 }
 0x5db   : > { %v2214_v55 = vsub.f32 %v1164_v44, %v1183_v1  ;;  %s1751_s24 = sshra.s32 %s1449_s20, 4  ;;  %s1752_s24 = int_to_ptr.hbm [resolvable:$true] %s1751_s24 }
 0x5dc   : > { %s1753_s25 = scalar_lea.hbm %s1752_s24, 24  ;;  %p1758_p0 = scmp.lt.s32.totalorder %s1752_s24, %s2355_s17 }
 0x5dd   : > { %v1189_v2 = vmul.f32 %v2214_v55, %v2214_v55  ;;  %p1754_p11 = scmp.ne.s32.totalorder %s1752_s24, %s1753_s25  ;;  %p1759_p1 = scmp.lt.s32.totalorder %s1757_s1, %s1753_s25 }
 0x5df   : > { %v1194_v3 = vsel %vm601_vm1, %v1189_v2, 0.0  ;;  %p1755_p12 = pnand %p1754_p11, %p1942_p5  ;;  %p1760_p2 = por %p1759_p1, %p1758_p0 }
 0x5e0   : > { %1195 = vadd.xlane.f32.xlu1 %v1194_v3  ;;  %v1174_v5 = vpop.xlane.xlu2 %1173 }
 0x5e1   : > { %v1184_v6 = vmul.f32 %v2209_v25, %v1174_v5  ;;  %p1756_p13 = pneg %p1755_p12 }
 0x5e3   : > { %v2220_v7 = vsub.f32 %v1165_v21, %v1184_v6  ;;  %p1761_p3 = pnand %p1760_p2, %p1756_p13 }
 0x5e5   : > { %v1190_v8 = vmul.f32 %v2220_v7, %v2220_v7 }
 0x5e7   : > { %v1197_v39 = vsel %vm601_vm1, %v1190_v8, 0.0 }
 0x5e8   : > { %1198 = vadd.xlane.f32.xlu2 %v1197_v39 }
 0x64b   : > { %v1193_v12 = vpop.xlane.xlu0 %1192 }
 0x64c   : > { %v1200_v13 = vmul.f32 %v1193_v12, %v2209_v25 }
 0x64e   : > { %v1203_v15 = vadd.f32 1e-05, %v1200_v13 }
 0x650   : > { %1713 = vrsqrt.f32 %v1203_v15  ;;  %vm1212_vm6 = vweird.f32 %v1203_v15 }
 0x653   : > { %v1196_v16 = vpop.xlane.xlu1 %1195 }
 0x654   : > { %v1201_v17 = vmul.f32 %v1196_v16, %v2209_v25 }
 0x656   : > { %v1714_v18 = vpop.eup %1713  ;;  %v1204_v19 = vadd.f32 1e-05, %v1201_v17 }
 0x657   : > { %v1207_v20 = vmul.f32 %v1714_v18, %v1203_v15  ;;  %vm1213_vm5 = vweird.f32 %v1714_v18 }
 0x658   : > { %1715 = vrsqrt.f32 %v1204_v19  ;;  %vm1214_vm7 = vmor %vm1212_vm6, %vm1213_vm5  ;;  %vm1222_vm9 = vweird.f32 %v1204_v19 }
 0x659   : > { %v1208_v63 = vmul.f32 %v1714_v18, %v1207_v20 }
 0x65b   : > { %v1209_v26 = vmul.f32 0.5, %v1208_v63  ;;  %v1199_v41 = vpop.xlane.xlu2 %1198 }
 0x65c   : > { %v1202_v27 = vmul.f32 %v1199_v41, %v2209_v25 }
 0x65d   : > { %v1210_v32 = vsub.f32 1.5, %v1209_v26 }
 0x65e   : > { %v1716_v33 = vpop.eup %1715  ;;  %v1205_v34 = vadd.f32 1e-05, %v1202_v27 }
 0x65f   : > { %v1211_v35 = vmul.f32 %v1714_v18, %v1210_v32  ;;  %v1217_v31 = vmul.f32 %v1716_v33, %v1204_v19  ;;  %vm1223_vm8 = vweird.f32 %v1716_v33 }
 0x660   : > { %1717 = vrsqrt.f32 %v1205_v34  ;;  %vm1224_vm10 = vmor %vm1222_vm9, %vm1223_vm8  ;;  %vm1232_vm12 = vweird.f32 %v1205_v34 }
 0x661   : > { %v1215_v38 = vsel %vm1214_vm7, %v1714_v18, %v1211_v35  ;;  %v1218_v57 = vmul.f32 %v1716_v33, %v1217_v31 }
 0x662   : > { %v1236_v40 = vmul.f32 %v1215_v38, %v1185_v59 }
 0x663   : > { %v1219_v43 = vmul.f32 0.5, %v1218_v57 }
 0x664   : > { %v1243_v44 = vmul.f32 %v1657_v28, %v1236_v40 }
 0x665   : > { %v1220_v45 = vsub.f32 1.5, %v1219_v43 }
 0x666   : > { %v1718_v47 = vpop.eup %1717  ;;  %v1250_v48 = vadd.f32 %v1658_v60, %v1243_v44 }
 0x667   : > { %v1221_v0 = vmul.f32 %v1716_v33, %v1220_v45  ;;  %v1227_v49 = vmul.f32 %v1718_v47, %v1205_v34  ;;  %vm1233_vm11 = vweird.f32 %v1718_v47 }
 0x668   : > { %1578 = vmatmul.msk.f32.vlgmr.msra.gmra.mxu3 %vm601_vm1, %v1250_v48  ;;  %vm1234_vm13 = vmor %vm1232_vm12, %vm1233_vm11 }
 0x669   : > { %v1225_v21 = vsel %vm1224_vm10, %v1716_v33, %v1221_v0  ;;  %v1228_v50 = vmul.f32 %v1718_v47, %v1227_v49 }
 0x66a   : > { %v1237_v36 = vmul.f32 %v1225_v21, %v2214_v55 }
 0x66b   : > { %v1229_v51 = vmul.f32 0.5, %v1228_v50 }
 0x66c   : > { %v1244_v52 = vmul.f32 %v1657_v28, %v1237_v36 }
 0x66d   : > { %v1230_v53 = vsub.f32 1.5, %v1229_v51 }
 0x66e   : > { %v1251_v4 = vadd.f32 %v1658_v60, %v1244_v52 }
 0x66f   : > { %v1231_v54 = vmul.f32 %v1718_v47, %v1230_v53  ;;  %v1661_v53 = vld [vmem:[%s2353_s15] ss:$0 sm:$0xff] }
 0x670   : > { %1579 = vmatmul.msk.f32.gmra.mxu3 %vm601_vm1, %v1251_v4 }
 0x671   : > { %v1235_v56 = vsel %vm1234_vm13, %v1718_v47, %v1231_v54 }
 0x672   : > { %v1238_v58 = vmul.f32 %v1235_v56, %v2220_v7 }
 0x674   : > { %v1245_v59 = vmul.f32 %v1657_v28, %v1238_v58 }
 0x676   : > { %v1252_v61 = vadd.f32 %v1658_v60, %v1245_v59 }
 0x678   : > { %1580 = vmatmul.msk.f32.gmra.mxu3 %vm601_vm1, %v1252_v61 }
 0x6eb   : > { %v1287_v1 = vpop.f32.mrf.mxu3 }
 0x6ec   : > { %v1288_v55 = vadd.f32 %v1659_v62, %v1287_v1 }
 0x6ee   : > { %v1296_v2 = vmax.f32 %v1288_v55, 0.0 }
 0x6f0   : > { %1581 = vmatmul.msk.f32.vlgmr.msrb.gmra.mxu0 %vm1311_vm14, %v1296_v2 }
 0x6f3   : > { %v1290_v3 = vpop.f32.mrf.mxu3 }
 0x6f4   : > { %v1291_v5 = vadd.f32 %v1659_v62, %v1290_v3 }
 0x6f6   : > { %v1297_v6 = vmax.f32 %v1291_v5, 0.0 }
 0x6f8   : > { %1582 = vmatmul.msk.f32.gmra.mxu0 %vm1311_vm14, %v1297_v6 }
 0x6fb   : > { %v1293_v7 = vpop.f32.mrf.mxu3 }
 0x6fc   : > { %v1294_v8 = vadd.f32 %v1659_v62, %v1293_v7 }
 0x6fe   : > { %v1298_v39 = vmax.f32 %v1294_v8, 0.0 }
 0x700   : > { %1583 = vmatmul.msk.f32.gmra.mxu0 %vm1311_vm14, %v1298_v39 }
 0x76d   : > { %v1338_v46 = vpop.f32.mrf.mxu0 }
 0x76e   : > { %v1339_v10 = vadd.f32 %v1660_v9, %v1338_v46 }
 0x770   : > { %v1347_v11 = vadd.f32 %v1339_v10, %v1250_v48 }
 0x772   : > { %v1350_v12 = vsel %vm601_vm1, %v1347_v11, 0.0 }
 0x773   : > { %1351 = vadd.xlane.f32.xlu0 %v1350_v12 }
 0x775   : > { %v1341_v13 = vpop.f32.mrf.mxu0 }
 0x776   : > { %v1342_v15 = vadd.f32 %v1660_v9, %v1341_v13 }
 0x778   : > { %v1348_v16 = vadd.f32 %v1342_v15, %v1251_v4 }
 0x77a   : > { %v1353_v17 = vsel %vm601_vm1, %v1348_v16, 0.0 }
 0x77b   : > { %1354 = vadd.xlane.f32.xlu1 %v1353_v17 }
 0x77d   : > { %v1344_v18 = vpop.f32.mrf.mxu0 }
 0x77e   : > { %v1345_v19 = vadd.f32 %v1660_v9, %v1344_v18 }
 0x780   : > { %v1349_v20 = vadd.f32 %v1345_v19, %v1252_v61 }
 0x782   : > { %v1356_v22 = vsel %vm601_vm1, %v1349_v20, 0.0 }
 0x783   : > { %1357 = vadd.xlane.f32.xlu2 %v1356_v22 }
 0x7e6   : > { %v1352_v23 = vpop.xlane.xlu0 %1351 }
 0x7e7   : > { %v1359_v63 = vmul.f32 %v1352_v23, %v2209_v25 }
 0x7e9   : > { %v1362_v24 = vsub.f32 %v1347_v11, %v1359_v63 }
 0x7eb   : > { %v1365_v26 = vmul.f32 %v1362_v24, %v1362_v24 }
 0x7ed   : > { %v1368_v41 = vsel %vm601_vm1, %v1365_v26, 0.0 }
 0x7ee   : > { %v1355_v27 = vpop.xlane.xlu1 %1354  ;;  %1369 = vadd.xlane.f32.xlu0 %v1368_v41 }
 0x7ef   : > { %v1360_v30 = vmul.f32 %v1355_v27, %v2209_v25 }
 0x7f1   : > { %v1363_v32 = vsub.f32 %v1348_v16, %v1360_v30 }
 0x7f3   : > { %v1366_v33 = vmul.f32 %v1363_v32, %v1363_v32 }
 0x7f5   : > { %v1371_v34 = vsel %vm601_vm1, %v1366_v33, 0.0 }
 0x7f6   : > { %1372 = vadd.xlane.f32.xlu1 %v1371_v34  ;;  %v1358_v29 = vpop.xlane.xlu2 %1357 }
 0x7f7   : > { %v1361_v35 = vmul.f32 %v1358_v29, %v2209_v25 }
 0x7f9   : > { %v1364_v31 = vsub.f32 %v1349_v20, %v1361_v35 }
 0x7fb   : > { %v1367_v28 = vmul.f32 %v1364_v31, %v1364_v31 }
 0x7fd   : > { %v1374_v37 = vsel %vm601_vm1, %v1367_v28, 0.0 }
 0x7fe   : > { %1375 = vadd.xlane.f32.xlu2 %v1374_v37 }
 0x861   : > { %v1370_v38 = vpop.xlane.xlu0 %1369 }
 0x862   : > { %v1377_v57 = vmul.f32 %v1370_v38, %v2209_v25 }
 0x864   : > { %v1380_v40 = vadd.f32 1e-05, %v1377_v57 }
 0x866   : > { %1719 = vrsqrt.f32 %v1380_v40  ;;  %vm1389_vm0 = vweird.f32 %v1380_v40 }
 0x869   : > { %v1373_v60 = vpop.xlane.xlu1 %1372 }
 0x86a   : > { %v1378_v42 = vmul.f32 %v1373_v60, %v2209_v25 }
 0x86c   : > { %v1720_v43 = vpop.eup %1719  ;;  %v1381_v44 = vadd.f32 1e-05, %v1378_v42 }
 0x86d   : > { %v1384_v45 = vmul.f32 %v1720_v43, %v1380_v40  ;;  %vm1390_vm15 = vweird.f32 %v1720_v43 }
 0x86e   : > { %1721 = vrsqrt.f32 %v1381_v44  ;;  %vm1391_vm2 = vmor %vm1389_vm0, %vm1390_vm15  ;;  %vm1399_vm4 = vweird.f32 %v1381_v44 }
 0x86f   : > { %v1385_v47 = vmul.f32 %v1720_v43, %v1384_v45 }
 0x871   : > { %v1386_v48 = vmul.f32 0.5, %v1385_v47  ;;  %v1376_v0 = vpop.xlane.xlu2 %1375 }
 0x872   : > { %v1379_v49 = vmul.f32 %v1376_v0, %v2209_v25  ;;  %v1662_v25 = vld [vmem:[%s2354_s16] ss:$0 sm:$0xff] }
 0x873   : > { %v1387_v21 = vsub.f32 1.5, %v1386_v48 }
 0x874   : > { %v1722_v50 = vpop.eup %1721  ;;  %v1382_v36 = vadd.f32 1e-05, %v1379_v49 }
 0x875   : > { %v1388_v51 = vmul.f32 %v1720_v43, %v1387_v21  ;;  %v1394_v52 = vmul.f32 %v1722_v50, %v1381_v44  ;;  %vm1400_vm3 = vweird.f32 %v1722_v50 }
 0x876   : > { %1723 = vrsqrt.f32 %v1382_v36  ;;  %vm1401_vm5 = vmor %vm1399_vm4, %vm1400_vm3  ;;  %vm1409_vm7 = vweird.f32 %v1382_v36 }
 0x877   : > { %v1392_v4 = vsel %vm1391_vm2, %v1720_v43, %v1388_v51  ;;  %v1395_v54 = vmul.f32 %v1722_v50, %v1394_v52 }
 0x878   : > { %v1413_v56 = vmul.f32 %v1392_v4, %v1362_v24 }
 0x879   : > { %v1396_v58 = vmul.f32 0.5, %v1395_v54 }
 0x87a   : > { %v1420_v59 = vmul.f32 %v1661_v53, %v1413_v56 }
 0x87b   : > { %v1397_v61 = vsub.f32 1.5, %v1396_v58 }
 0x87c   : > { %v1724_v14 = vpop.eup %1723  ;;  %v1427_v62 = vadd.f32 %v1662_v25, %v1420_v59 }
 0x87d   : > { %v1398_v1 = vmul.f32 %v1722_v50, %v1397_v61  ;;  %v1404_v55 = vmul.f32 %v1724_v14, %v1382_v36  ;;  %vm1410_vm6 = vweird.f32 %v1724_v14 }
 0x87e   : > { %1430 = vst.msk [vmem:[%s536_s23] sm:$0xff] %vm601_vm1, %v1427_v62  ;;  %vm1411_vm8 = vmor %vm1409_vm7, %vm1410_vm6 }
 0x87f   : > { %v1402_v2 = vsel %vm1401_vm5, %v1722_v50, %v1398_v1  ;;  %v1405_v3 = vmul.f32 %v1724_v14, %v1404_v55 }
 0x880   : > { %v1414_v5 = vmul.f32 %v1402_v2, %v1363_v32 }
 0x881   : > { %v1406_v6 = vmul.f32 0.5, %v1405_v3 }
 0x882   : > { %v1421_v7 = vmul.f32 %v1661_v53, %v1414_v5 }
 0x883   : > { %v1407_v8 = vsub.f32 1.5, %v1406_v6 }
 0x884   : > { %v1428_v39 = vadd.f32 %v1662_v25, %v1421_v7 }
 0x885   : > { %v1408_v9 = vmul.f32 %v1724_v14, %v1407_v8 }
 0x886   : > { %1431 = vst.msk [vmem:[%s536_s23 + $0x8] sm:$0xff] %vm601_vm1, %v1428_v39 }
 0x887   : > { %v1412_v46 = vsel %vm1411_vm8, %v1724_v14, %v1408_v9 }
 0x888   : > { %v1415_v10 = vmul.f32 %v1412_v46, %v1364_v31 }
 0x88a   : > { %v1422_v11 = vmul.f32 %v1661_v53, %v1415_v10 }
 0x88c   : > { %v1429_v12 = vadd.f32 %v1662_v25, %v1422_v11 }
 0x88e   : > { %1432 = vst.msk [vmem:[%s536_s23 + $0x10] sm:$0xff] %vm601_vm1, %v1429_v12 }
 0x88f   : > { %1764 = shalt.err (!%p1761_p3)
}
 0x890   : > { %s1809_s30 = smov 128   ;;  %s1810_s23 = smov 8  }
 0x891   : > { %1593 = dma.vmem_to_hbm [thread:$0]  (%p1942_p5), %s1447_s28, 384, %s1449_s20, %s1434_s10, %s1809_s30, %s1809_s30, %s1810_s23  }
 0x892 PF: > { %s2378_s21 = sld [smem:[#allocation10_spill]] }
 0x893   : > { %s2379_s19 = sld [smem:[#allocation8_spill]] }
 0x898   : > { %p1599_p4 = scmp.ge.s32.totalorder %s2378_s21, 2 }
 0x899   : > { %s1463_s26 = sand.u32 1, %s2379_s19  }
 0x89a   : > { %p1596_p7 = pnand %p1599_p4, %p1946_p6  ;;  %s1464_s18 = scalar_lea.sflag [#allocation5], %s1463_s26 }
 0x89c   : > { %p1597_p8 = pneg %p1596_p7 }
 0x89e   : > { %1784 = dma.done.wait (%p1597_p8), %s1464_s18, 384  }
 0x89f   : > { %1786 = vsyncadd (%p1597_p8), %s1464_s18, 4294966912  ;;  %s2381_s30 = sld [smem:[#allocation11_spill]]  ;;  %s2384_s28 = smov %s1793_s29 }
 0x8a0   : > { %s2382_s24 = sld [smem:[#allocation9_spill]] }
 0x8a1   : > { %s2383_s0 = sld [smem:[#allocation12_spill]] }
 0x8a5   : > { %p35_p9 = scmp.ge.s32.totalorder %s2381_s30, 4  }
 0x8a6   : > { %s2385_s29 = smov %s2382_s24 }
 0x8a7   :  { %37 = sbr.rel (!%p35_p9) target bundleno = 19 (0x13), region = 122 }
 0x8ac   :  { %1470 = vsyncpa [#allocation5], 1 }
 0x8ad   :  { %1472 = vsyncpa [#allocation5 + $0x1], 1 }

</bundles_post_ra>
